<compile_context>
chip_gen: v5e
topology: v5e:2x2
jax: 0.10.0
libtpu: 0.0.40
codegen_flags: <defaults>
</compile_context>

<pallas_src>
import functools

import jax
import jax.numpy as jnp
from jax.experimental import pallas as pl
from jax.experimental.pallas import tpu as pltpu


# ----------------------------------------------------------------------------
# DDPM schedules (linear), identical math to the standard ddpm_schedules()
# registered as buffers in the PyTorch module's __init__.
# ----------------------------------------------------------------------------
def ddpm_schedules(beta1, beta2, n_T):
    t = jnp.arange(0, n_T + 1, dtype=jnp.float32)
    beta_t = (beta2 - beta1) * t / n_T + beta1
    sqrt_beta_t = jnp.sqrt(beta_t)
    alpha_t = 1.0 - beta_t
    log_alpha_t = jnp.log(alpha_t)
    alphabar_t = jnp.exp(jnp.cumsum(log_alpha_t))
    sqrtab = jnp.sqrt(alphabar_t)
    oneover_sqrta = 1.0 / jnp.sqrt(alpha_t)
    sqrtmab = jnp.sqrt(1.0 - alphabar_t)
    mab_over_sqrtmab = (1.0 - alpha_t) / sqrtmab
    return dict(
        beta_t=beta_t, sqrt_beta_t=sqrt_beta_t, alpha_t=alpha_t,
        log_alpha_t=log_alpha_t, alphabar_t=alphabar_t, sqrtab=sqrtab,
        oneover_sqrta=oneover_sqrta, sqrtmab=sqrtmab,
        mab_over_sqrtmab=mab_over_sqrtmab,
    )


# ----------------------------------------------------------------------------
# Fused Pallas kernel: schedule lookup + q-sample + eps-predictor + loss.
# One grid step handles one batch tile of TB rows; the loss accumulates into a
# resident (1,1) output block across the grid.
# ----------------------------------------------------------------------------
def _ddpm_forward_kernel(x_ref, noise_ref, ts_ref, c_ref, mask_ref,
                         sab_tab_ref, smab_tab_ref,
                         w1_ref, wc_ref, b1_ref, w2_ref, b2_ref,
                         loss_ref,
                         *, n_T, num_classes, b_real, denom, loss_type):
    i = pl.program_id(0)
    TB, _D = x_ref.shape
    T_pad = sab_tab_ref.shape[1]
    KC = wc_ref.shape[0]

    x = x_ref[...]            # (TB, D) f32
    noise = noise_ref[...]    # (TB, D) f32
    ts = ts_ref[...]          # (TB, 1) int32

    # --- schedule lookup: sqrtab[t], sqrtmab[t] via iota==t against resident tables
    lane_t = jax.lax.broadcasted_iota(jnp.int32, (TB, T_pad), 1)
    sel = lane_t == ts
    sab = jnp.sum(jnp.where(sel, sab_tab_ref[...], 0.0), axis=1, keepdims=True)
    smab = jnp.sum(jnp.where(sel, smab_tab_ref[...], 0.0), axis=1, keepdims=True)

    # --- q-sample: x_t = sqrtab[t] * x + sqrtmab[t] * noise  (f32 VPU)
    x_t = sab * x + smab * noise

    # --- conditioning built in-kernel: [one_hot(c) * (1 - context_mask), t/n_T, 0...]
    lane_c = jax.lax.broadcasted_iota(jnp.int32, (TB, KC), 1)
    keep = 1.0 - mask_ref[...]                                  # (TB, 1)
    t_norm = ts.astype(jnp.float32) * (1.0 / float(n_T))        # (TB, 1)
    cond = (jnp.where(lane_c == c_ref[...], keep, 0.0)
            + jnp.where(lane_c == num_classes, t_norm, 0.0))    # (TB, KC) f32

    # --- eps predictor (surrogate nn_model): bf16 MXU operands, f32 accumulation
    h = jnp.dot(x_t.astype(jnp.bfloat16), w1_ref[...],
                preferred_element_type=jnp.float32)
    h = h + jnp.dot(cond.astype(jnp.bfloat16), wc_ref[...],
                    preferred_element_type=jnp.float32)
    h = jax.nn.gelu(h + b1_ref[...])
    eps = jnp.dot(h.astype(jnp.bfloat16), w2_ref[...],
                  preferred_element_type=jnp.float32) + b2_ref[...]

    # --- loss over valid (un-padded) rows only
    row = jax.lax.broadcasted_iota(jnp.int32, (TB, 1), 0) + i * TB
    valid = (row < b_real).astype(jnp.float32)                  # (TB, 1)
    diff = noise - eps
    if loss_type == "MSE":
        per = diff * diff
    elif loss_type == "MAE":
        per = jnp.abs(diff)
    elif loss_type == "Huber":
        a = jnp.abs(diff)
        per = jnp.where(a < 1.0, 0.5 * diff * diff, a - 0.5)
    else:
        raise ValueError(f"unknown loss {loss_type}")
    partial = jnp.sum(jnp.sum(per, axis=1, keepdims=True) * valid)

    # --- scalar accumulator across the batch grid
    @pl.when(i == 0)
    def _init():
        loss_ref[...] = jnp.zeros_like(loss_ref)

    loss_ref[...] += partial

    @pl.when(i == pl.num_programs(0) - 1)
    def _finalize():
        loss_ref[...] = loss_ref[...] * (1.0 / float(denom))


def _run_fused_kernel(x_flat, noise_flat, ts_col, c_col, mask_col,
                      sab_tab, smab_tab, params, *, tb, n_T, num_classes,
                      b_real, loss_type):
    B_pad, D = x_flat.shape
    H = params["w1"].shape[1]
    KC = params["wc"].shape[0]
    T_pad = sab_tab.shape[1]
    grid = (B_pad // tb,)

    def row_spec(shape):
        return pl.BlockSpec(shape, lambda i: (i, 0))

    def resident_spec(shape):
        return pl.BlockSpec(shape, lambda i: (0, 0))

    kernel = functools.partial(
        _ddpm_forward_kernel, n_T=n_T, num_classes=num_classes,
        b_real=b_real, denom=b_real * D, loss_type=loss_type)

    cost = pl.CostEstimate(
        flops=4 * B_pad * D * H + 2 * B_pad * KC * H,
        transcendentals=B_pad * H,
        bytes_accessed=2 * B_pad * D * 4 + (D * H + H * D + KC * H) * 2
                       + B_pad * 16 + 2 * T_pad * 4,
    )

    return pl.pallas_call(
        kernel,
        out_shape=jax.ShapeDtypeStruct((1, 1), jnp.float32),
        grid_spec=pltpu.PrefetchScalarGridSpec(
            num_scalar_prefetch=0,
            grid=grid,
            in_specs=[
                row_spec((tb, D)),          # x          (pipelined per tile)
                row_spec((tb, D)),          # noise      (pipelined per tile)
                row_spec((tb, 1)),          # t          (int32 column)
                row_spec((tb, 1)),          # c          (int32 column)
                row_spec((tb, 1)),          # context_mask
                resident_spec((1, T_pad)),  # sqrtab table   (resident)
                resident_spec((1, T_pad)),  # sqrtmab table  (resident)
                resident_spec((D, H)),      # w1 (bf16, resident)
                resident_spec((KC, H)),     # wc (bf16, resident)
                resident_spec((1, H)),      # b1 (f32)
                resident_spec((H, D)),      # w2 (bf16, resident)
                resident_spec((1, D)),      # b2 (f32)
            ],
            out_specs=pl.BlockSpec((1, 1), lambda i: (0, 0)),   # loss accumulator
        ),
        compiler_params=pltpu.CompilerParams(
            # The batch grid axis carries the loss reduction (output block is
            # resident across it), so it must be "arbitrary".
            dimension_semantics=("arbitrary",),
            # Explicit budget well under v7x's 64 MiB physical VMEM.
            vmem_limit_bytes=48 * 1024 * 1024,
        ),
        cost_estimate=cost,
    )(x_flat, noise_flat, ts_col, c_col, mask_col, sab_tab, smab_tab,
      params["w1"], params["wc"], params["b1"], params["w2"], params["b2"])


# ----------------------------------------------------------------------------
# Python-side module equivalent.
# ----------------------------------------------------------------------------
class CDDPMMixedPallas:
    def __init__(self, params, betas, n_T, drop_prob=0.1, num_classes=10,
                 loss="MSE", restrict_l_mode=None, restrict_u_mode=None,
                 restrict_l_thresh=0, restrict_u_thresh=0):
        self.params = params
        self.n_T = n_T
        self.drop_prob = drop_prob
        self.num_classes = num_classes
        self.loss_type = loss
        self.restrict_l_mode = restrict_l_mode
        self.restrict_u_mode = restrict_u_mode
        self.restrict_l_thresh = restrict_l_thresh
        self.restrict_u_thresh = restrict_u_thresh
        self.buffers = ddpm_schedules(betas[0], betas[1], n_T)
        # Lane-aligned (1, T_pad) schedule tables, kept VMEM-resident in the kernel.
        t_pad = ((n_T + 1 + 127) // 128) * 128
        pad = t_pad - (n_T + 1)
        self.sab_tab = jnp.pad(self.buffers["sqrtab"], (0, pad)).reshape(1, t_pad)
        self.smab_tab = jnp.pad(self.buffers["sqrtmab"], (0, pad)).reshape(1, t_pad)

    def _sample_ts(self, key, B, unlabelled):
        lo, hi = 1, self.n_T + 1
        if unlabelled:
            if self.restrict_u_mode == "first":
                lo, hi = 1, self.restrict_u_thresh + 1
            elif self.restrict_u_mode == "last":
                lo, hi = self.restrict_u_thresh, self.n_T + 1
        else:
            if self.restrict_l_mode == "first":
                lo, hi = 1, self.restrict_l_thresh + 1
            elif self.restrict_l_mode == "last":
                lo, hi = self.restrict_l_thresh, self.n_T + 1
        return jax.random.randint(key, (B,), lo, hi)

    def forward(self, x, c, key, unlabelled=False):
        """Training forward: samples t, noise, context_mask and returns the loss."""
        B = x.shape[0]
        D = x.size // B
        k_t, k_noise, k_mask = jax.random.split(key, 3)

        # torch.randint(...) with the restrict_* range logic
        _ts = self._sample_ts(k_t, B, unlabelled)
        # torch.randn_like(x)
        noise = jax.random.normal(k_noise, x.shape, dtype=jnp.float32)
        # torch.bernoulli(drop_prob)  (or all-ones when unlabelled)
        p = 1.0 if unlabelled else self.drop_prob
        context_mask = jax.random.bernoulli(k_mask, p, (B,)).astype(jnp.float32)

        # Batch tile: multiple of 8 sublanes; 256 rows (MXU height) for large B.
        tb = 256 if B >= 256 else max(8, ((B + 7) // 8) * 8)
        b_pad = ((B + tb - 1) // tb) * tb

        def pad_rows(a):
            return jnp.pad(a, ((0, b_pad - B),) + ((0, 0),) * (a.ndim - 1))

        x_flat = pad_rows(x.reshape(B, D).astype(jnp.float32))
        noise_flat = pad_rows(noise.reshape(B, D))
        ts_col = pad_rows(_ts.astype(jnp.int32).reshape(B, 1))
        c_col = pad_rows(c.astype(jnp.int32).reshape(B, 1))
        mask_col = pad_rows(context_mask.reshape(B, 1))

        loss = _run_fused_kernel(
            x_flat, noise_flat, ts_col, c_col, mask_col,
            self.sab_tab, self.smab_tab, self.params,
            tb=tb, n_T=self.n_T, num_classes=self.num_classes,
            b_real=B, loss_type=self.loss_type)
        return loss[0, 0]


def init_params(key, D, hidden=128, k_cond=128):
    k1, k2, k3 = jax.random.split(key, 3)
    w1 = jax.random.normal(k1, (D, hidden), jnp.float32) * (1.0 / jnp.sqrt(D))
    wc = jax.random.normal(k2, (k_cond, hidden), jnp.float32) * (1.0 / jnp.sqrt(k_cond))
    w2 = jax.random.normal(k3, (hidden, D), jnp.float32) * (1.0 / jnp.sqrt(hidden))
    # Weights stored bf16 (MXU operand dtype); biases stay f32.
    return {
        "w1": w1.astype(jnp.bfloat16),
        "wc": wc.astype(jnp.bfloat16),
        "b1": jnp.zeros((1, hidden), jnp.float32),
        "w2": w2.astype(jnp.bfloat16),
        "b2": jnp.zeros((1, D), jnp.float32),
    }


if __name__ == "__main__":
    # Small shapes consistent with the module's forward: x (B, C, H, W), c (B,)
    B, C, H, W = 2, 4, 16, 16
    n_T = 400
    num_classes = 10

    key = jax.random.PRNGKey(0)
    k_x, k_c, k_param, k_fwd = jax.random.split(key, 4)

    x = jax.random.normal(k_x, (B, C, H, W), dtype=jnp.float32)
    c = jax.random.randint(k_c, (B,), 0, num_classes)

    params = init_params(k_param, D=C * H * W, hidden=128, k_cond=128)
    model = CDDPMMixedPallas(params, betas=(1e-4, 0.02), n_T=n_T,
                             drop_prob=0.1, num_classes=num_classes, loss="MSE")

    # TODO(synk): nn_model is an external module in the original code; a small
    # deterministic conditional MLP eps-predictor is used as its stand-in here.
    loss = model.forward(x, c, k_fwd)
    jax.block_until_ready(loss)
    assert loss.shape == () and bool(jnp.isfinite(loss))
    print("KERNEL_OK")
</pallas_src>

<mosaic_0001>
module attributes {stable_mosaic.version = 11 : i64} {
  func.func @_ddpm_forward_kernel(%arg0: i32, %arg1: memref<8x1024xf32, #tpu.memory_space<vmem>>, %arg2: memref<8x1024xf32, #tpu.memory_space<vmem>>, %arg3: memref<8x1xi32, #tpu.memory_space<vmem>>, %arg4: memref<8x1xi32, #tpu.memory_space<vmem>>, %arg5: memref<8x1xf32, #tpu.memory_space<vmem>>, %arg6: memref<1x512xf32, #tpu.memory_space<vmem>>, %arg7: memref<1x512xf32, #tpu.memory_space<vmem>>, %arg8: memref<1024x128xbf16, #tpu.memory_space<vmem>>, %arg9: memref<128x128xbf16, #tpu.memory_space<vmem>>, %arg10: memref<1x128xf32, #tpu.memory_space<vmem>>, %arg11: memref<128x1024xbf16, #tpu.memory_space<vmem>>, %arg12: memref<1x1024xf32, #tpu.memory_space<vmem>>, %arg13: memref<1x1xf32, #tpu.memory_space<vmem>>) attributes {dimension_semantics = [#tpu.dimension_semantics<arbitrary>], iteration_bounds = array<i64: 1>, scalar_prefetch = 0 : i64, scratch_operands = 0 : i64, tpu.core_type = #tpu.core_type<tc>, window_params = [{transform_indices = @transform_0, window_bounds = array<i64: 8, 1024>}, {transform_indices = @transform_1, window_bounds = array<i64: 8, 1024>}, {transform_indices = @transform_2, window_bounds = array<i64: 8, 1>}, {transform_indices = @transform_3, window_bounds = array<i64: 8, 1>}, {transform_indices = @transform_4, window_bounds = array<i64: 8, 1>}, {pipeline_mode = #tpu.pipeline_mode<synchronous>, transform_indices = @transform_5, window_bounds = array<i64: 1, 512>}, {pipeline_mode = #tpu.pipeline_mode<synchronous>, transform_indices = @transform_6, window_bounds = array<i64: 1, 512>}, {pipeline_mode = #tpu.pipeline_mode<synchronous>, transform_indices = @transform_7, window_bounds = array<i64: 1024, 128>}, {pipeline_mode = #tpu.pipeline_mode<synchronous>, transform_indices = @transform_8, window_bounds = array<i64: 128, 128>}, {pipeline_mode = #tpu.pipeline_mode<synchronous>, transform_indices = @transform_9, window_bounds = array<i64: 1, 128>}, {pipeline_mode = #tpu.pipeline_mode<synchronous>, transform_indices = @transform_10, window_bounds = array<i64: 128, 1024>}, {pipeline_mode = #tpu.pipeline_mode<synchronous>, transform_indices = @transform_11, window_bounds = array<i64: 1, 1024>}, {pipeline_mode = #tpu.pipeline_mode<synchronous>, transform_indices = @transform_12, window_bounds = array<i64: 1, 1>}]} {
    %c0 = arith.constant 0 : index
    %c0_0 = arith.constant 0 : index
    %0 = vector.load %arg1[%c0, %c0_0] : memref<8x1024xf32, #tpu.memory_space<vmem>>, vector<8x1024xf32>
    %c0_1 = arith.constant 0 : index
    %c0_2 = arith.constant 0 : index
    %1 = vector.load %arg2[%c0_1, %c0_2] : memref<8x1024xf32, #tpu.memory_space<vmem>>, vector<8x1024xf32>
    %c0_3 = arith.constant 0 : index
    %c0_4 = arith.constant 0 : index
    %2 = vector.load %arg3[%c0_3, %c0_4] : memref<8x1xi32, #tpu.memory_space<vmem>>, vector<8x1xi32>
    %3 = tpu.iota {dimensions = array<i32: 1>} : vector<8x512xi32>
    %4 = vector.broadcast %2 : vector<8x1xi32> to vector<8x512xi32>
    %5 = arith.cmpi eq, %3, %4 : vector<8x512xi32>
    %c0_5 = arith.constant 0 : index
    %c0_6 = arith.constant 0 : index
    %6 = vector.load %arg6[%c0_5, %c0_6] : memref<1x512xf32, #tpu.memory_space<vmem>>, vector<1x512xf32>
    %cst = arith.constant 0.000000e+00 : f32
    %7 = vector.shape_cast %6 : vector<1x512xf32> to vector<1x512xf32>
    %8 = vector.broadcast %7 : vector<1x512xf32> to vector<8x512xf32>
    %9 = vector.broadcast %cst : f32 to vector<8x512xf32>
    %10 = arith.select %5, %8, %9 : vector<8x512xi1>, vector<8x512xf32>
    %cst_7 = arith.constant dense<0.000000e+00> : vector<8xf32>
    %11 = vector.multi_reduction <add>, %10, %cst_7 [1] : vector<8x512xf32> to vector<8xf32>
    %12 = vector.shape_cast %11 : vector<8xf32> to vector<8x1xf32>
    %c0_8 = arith.constant 0 : index
    %c0_9 = arith.constant 0 : index
    %13 = vector.load %arg7[%c0_8, %c0_9] : memref<1x512xf32, #tpu.memory_space<vmem>>, vector<1x512xf32>
    %cst_10 = arith.constant 0.000000e+00 : f32
    %14 = vector.shape_cast %13 : vector<1x512xf32> to vector<1x512xf32>
    %15 = vector.broadcast %14 : vector<1x512xf32> to vector<8x512xf32>
    %16 = vector.broadcast %cst_10 : f32 to vector<8x512xf32>
    %17 = arith.select %5, %15, %16 : vector<8x512xi1>, vector<8x512xf32>
    %cst_11 = arith.constant dense<0.000000e+00> : vector<8xf32>
    %18 = vector.multi_reduction <add>, %17, %cst_11 [1] : vector<8x512xf32> to vector<8xf32>
    %19 = vector.shape_cast %18 : vector<8xf32> to vector<8x1xf32>
    %20 = vector.broadcast %12 : vector<8x1xf32> to vector<8x1024xf32>
    %21 = arith.mulf %20, %0 : vector<8x1024xf32>
    %22 = vector.broadcast %19 : vector<8x1xf32> to vector<8x1024xf32>
    %23 = arith.mulf %22, %1 : vector<8x1024xf32>
    %24 = arith.addf %21, %23 : vector<8x1024xf32>
    %25 = tpu.iota {dimensions = array<i32: 1>} : vector<8x128xi32>
    %c0_12 = arith.constant 0 : index
    %c0_13 = arith.constant 0 : index
    %26 = vector.load %arg5[%c0_12, %c0_13] : memref<8x1xf32, #tpu.memory_space<vmem>>, vector<8x1xf32>
    %cst_14 = arith.constant 1.000000e+00 : f32
    %27 = vector.broadcast %cst_14 : f32 to vector<8x1xf32>
    %28 = arith.subf %27, %26 : vector<8x1xf32>
    %29 = arith.sitofp %2 : vector<8x1xi32> to vector<8x1xf32>
    %cst_15 = arith.constant 2.500000e-03 : f32
    %30 = vector.broadcast %cst_15 : f32 to vector<8x1xf32>
    %31 = arith.mulf %29, %30 : vector<8x1xf32>
    %c0_16 = arith.constant 0 : index
    %c0_17 = arith.constant 0 : index
    %32 = vector.load %arg4[%c0_16, %c0_17] : memref<8x1xi32, #tpu.memory_space<vmem>>, vector<8x1xi32>
    %33 = vector.broadcast %32 : vector<8x1xi32> to vector<8x128xi32>
    %34 = arith.cmpi eq, %25, %33 : vector<8x128xi32>
    %cst_18 = arith.constant 0.000000e+00 : f32
    %35 = vector.shape_cast %28 : vector<8x1xf32> to vector<8x1xf32>
    %36 = vector.broadcast %35 : vector<8x1xf32> to vector<8x128xf32>
    %37 = vector.broadcast %cst_18 : f32 to vector<8x128xf32>
    %38 = arith.select %34, %36, %37 : vector<8x128xi1>, vector<8x128xf32>
    %c10_i32 = arith.constant 10 : i32
    %39 = vector.broadcast %c10_i32 : i32 to vector<8x128xi32>
    %40 = arith.cmpi eq, %25, %39 : vector<8x128xi32>
    %cst_19 = arith.constant 0.000000e+00 : f32
    %41 = vector.shape_cast %31 : vector<8x1xf32> to vector<8x1xf32>
    %42 = vector.broadcast %41 : vector<8x1xf32> to vector<8x128xf32>
    %43 = vector.broadcast %cst_19 : f32 to vector<8x128xf32>
    %44 = arith.select %40, %42, %43 : vector<8x128xi1>, vector<8x128xf32>
    %45 = arith.addf %38, %44 : vector<8x128xf32>
    %46 = arith.truncf %24 : vector<8x1024xf32> to vector<8x1024xbf16>
    %c0_20 = arith.constant 0 : index
    %c0_21 = arith.constant 0 : index
    %47 = vector.load %arg8[%c0_20, %c0_21] : memref<1024x128xbf16, #tpu.memory_space<vmem>>, vector<1024x128xbf16>
    %cst_22 = arith.constant dense<0.000000e+00> : vector<8x128xf32>
    %48 = tpu.matmul %46, %47, %cst_22 {dimension_numbers = #tpu.dot_dimension_numbers<[1], [0], [0], [1], [0, 0, 1, 1], [], []>} : vector<8x1024xbf16>, vector<1024x128xbf16>, vector<8x128xf32> -> vector<8x128xf32>
    %49 = arith.truncf %45 : vector<8x128xf32> to vector<8x128xbf16>
    %c0_23 = arith.constant 0 : index
    %c0_24 = arith.constant 0 : index
    %50 = vector.load %arg9[%c0_23, %c0_24] : memref<128x128xbf16, #tpu.memory_space<vmem>>, vector<128x128xbf16>
    %cst_25 = arith.constant dense<0.000000e+00> : vector<8x128xf32>
    %51 = tpu.matmul %49, %50, %cst_25 {dimension_numbers = #tpu.dot_dimension_numbers<[1], [0], [0], [1], [0, 0, 1, 1], [], []>} : vector<8x128xbf16>, vector<128x128xbf16>, vector<8x128xf32> -> vector<8x128xf32>
    %52 = arith.addf %48, %51 : vector<8x128xf32>
    %c0_26 = arith.constant 0 : index
    %c0_27 = arith.constant 0 : index
    %53 = vector.load %arg10[%c0_26, %c0_27] : memref<1x128xf32, #tpu.memory_space<vmem>>, vector<1x128xf32>
    %54 = vector.broadcast %53 : vector<1x128xf32> to vector<8x128xf32>
    %55 = arith.addf %52, %54 : vector<8x128xf32>
    %56 = arith.mulf %55, %55 : vector<8x128xf32>
    %57 = arith.mulf %55, %56 : vector<8x128xf32>
    %cst_28 = arith.constant 4.471500e-02 : f32
    %58 = vector.broadcast %cst_28 : f32 to vector<8x128xf32>
    %59 = arith.mulf %58, %57 : vector<8x128xf32>
    %60 = arith.addf %55, %59 : vector<8x128xf32>
    %cst_29 = arith.constant 0.797884583 : f32
    %61 = vector.broadcast %cst_29 : f32 to vector<8x128xf32>
    %62 = arith.mulf %61, %60 : vector<8x128xf32>
    %63 = math.tanh %62 : vector<8x128xf32>
    %cst_30 = arith.constant 1.000000e+00 : f32
    %64 = vector.broadcast %cst_30 : f32 to vector<8x128xf32>
    %65 = arith.addf %64, %63 : vector<8x128xf32>
    %cst_31 = arith.constant 5.000000e-01 : f32
    %66 = vector.broadcast %cst_31 : f32 to vector<8x128xf32>
    %67 = arith.mulf %66, %65 : vector<8x128xf32>
    %68 = arith.mulf %55, %67 : vector<8x128xf32>
    %69 = arith.truncf %68 : vector<8x128xf32> to vector<8x128xbf16>
    %c0_32 = arith.constant 0 : index
    %c0_33 = arith.constant 0 : index
    %70 = vector.load %arg11[%c0_32, %c0_33] : memref<128x1024xbf16, #tpu.memory_space<vmem>>, vector<128x1024xbf16>
    %cst_34 = arith.constant dense<0.000000e+00> : vector<8x1024xf32>
    %71 = tpu.matmul %69, %70, %cst_34 {dimension_numbers = #tpu.dot_dimension_numbers<[1], [0], [0], [1], [0, 0, 1, 1], [], []>} : vector<8x128xbf16>, vector<128x1024xbf16>, vector<8x1024xf32> -> vector<8x1024xf32>
    %c0_35 = arith.constant 0 : index
    %c0_36 = arith.constant 0 : index
    %72 = vector.load %arg12[%c0_35, %c0_36] : memref<1x1024xf32, #tpu.memory_space<vmem>>, vector<1x1024xf32>
    %73 = vector.broadcast %72 : vector<1x1024xf32> to vector<8x1024xf32>
    %74 = arith.addf %71, %73 : vector<8x1024xf32>
    %75 = tpu.iota {dimensions = array<i32: 0>} : vector<8x1xi32>
    %c8_i32 = arith.constant 8 : i32
    %76 = arith.muli %arg0, %c8_i32 : i32
    %77 = vector.broadcast %76 : i32 to vector<8x1xi32>
    %78 = arith.addi %75, %77 : vector<8x1xi32>
    %c2_i32 = arith.constant 2 : i32
    %79 = vector.broadcast %c2_i32 : i32 to vector<8x1xi32>
    %80 = arith.cmpi slt, %78, %79 : vector<8x1xi32>
    %81 = arith.extui %80 : vector<8x1xi1> to vector<8x1xi32>
    %82 = arith.sitofp %81 : vector<8x1xi32> to vector<8x1xf32>
    %83 = arith.subf %1, %74 : vector<8x1024xf32>
    %84 = arith.mulf %83, %83 : vector<8x1024xf32>
    %cst_37 = arith.constant dense<0.000000e+00> : vector<8xf32>
    %85 = vector.multi_reduction <add>, %84, %cst_37 [1] : vector<8x1024xf32> to vector<8xf32>
    %86 = vector.shape_cast %85 : vector<8xf32> to vector<8x1xf32>
    %87 = arith.mulf %86, %82 : vector<8x1xf32>
    %88 = vector.shape_cast %87 : vector<8x1xf32> to vector<1x8x1xf32>
    %cst_38 = arith.constant dense<0.000000e+00> : vector<1xf32>
    %89 = vector.multi_reduction <add>, %88, %cst_38 [1, 2] : vector<1x8x1xf32> to vector<1xf32>
    %90 = vector.shape_cast %89 : vector<1xf32> to vector<1x1x1xf32>
    %91 = vector.extract %90[0, 0, 0] : f32 from vector<1x1x1xf32>
    %c0_i32 = arith.constant 0 : i32
    %92 = arith.cmpi eq, %arg0, %c0_i32 : i32
    %93 = arith.extui %92 : i1 to i32
    %c0_i32_39 = arith.constant 0 : i32
    %94 = arith.cmpi ne, %93, %c0_i32_39 : i32
    scf.if %94 {
      %cst_46 = arith.constant 0.000000e+00 : f32
      %102 = vector.broadcast %cst_46 : f32 to vector<1x1xf32>
      %c0_47 = arith.constant 0 : index
      %c0_48 = arith.constant 0 : index
      %103 = vector.load %arg13[%c0_47, %c0_48] : memref<1x1xf32, #tpu.memory_space<vmem>>, vector<1x1xf32>
      tpu.vector_store %arg13[%c0_47, %c0_48], %102 {strides = array<i32>} : memref<1x1xf32, #tpu.memory_space<vmem>>, vector<1x1xf32>,
    } else {
    }
    %c0_40 = arith.constant 0 : index
    %c0_41 = arith.constant 0 : index
    %95 = vector.load %arg13[%c0_40, %c0_41] : memref<1x1xf32, #tpu.memory_space<vmem>>, vector<1x1xf32>
    %96 = vector.broadcast %91 : f32 to vector<1x1xf32>
    %97 = arith.addf %95, %96 : vector<1x1xf32>
    %c0_42 = arith.constant 0 : index
    %c0_43 = arith.constant 0 : index
    %98 = vector.load %arg13[%c0_42, %c0_43] : memref<1x1xf32, #tpu.memory_space<vmem>>, vector<1x1xf32>
    tpu.vector_store %arg13[%c0_42, %c0_43], %97 {strides = array<i32>} : memref<1x1xf32, #tpu.memory_space<vmem>>, vector<1x1xf32>,
    %c0_i32_44 = arith.constant 0 : i32
    %99 = arith.cmpi eq, %arg0, %c0_i32_44 : i32
    %100 = arith.extui %99 : i1 to i32
    %c0_i32_45 = arith.constant 0 : i32
    %101 = arith.cmpi ne, %100, %c0_i32_45 : i32
    scf.if %101 {
      %c0_46 = arith.constant 0 : index
      %c0_47 = arith.constant 0 : index
      %102 = vector.load %arg13[%c0_46, %c0_47] : memref<1x1xf32, #tpu.memory_space<vmem>>, vector<1x1xf32>
      %cst_48 = arith.constant 4.8828125E-4 : f32
      %103 = vector.broadcast %cst_48 : f32 to vector<1x1xf32>
      %104 = arith.mulf %102, %103 : vector<1x1xf32>
      %c0_49 = arith.constant 0 : index
      %c0_50 = arith.constant 0 : index
      %105 = vector.load %arg13[%c0_49, %c0_50] : memref<1x1xf32, #tpu.memory_space<vmem>>, vector<1x1xf32>
      tpu.vector_store %arg13[%c0_49, %c0_50], %104 {strides = array<i32>} : memref<1x1xf32, #tpu.memory_space<vmem>>, vector<1x1xf32>,
    } else {
    }
    return
  }
  func.func @transform_0(%arg0: i32) -> (i32, i32) {
    %c0_i32 = arith.constant 0 : i32
    %c0_i32_0 = arith.constant 0 : i32
    return %arg0, %c0_i32 : i32, i32
  }
  func.func @transform_1(%arg0: i32) -> (i32, i32) {
    %c0_i32 = arith.constant 0 : i32
    %c0_i32_0 = arith.constant 0 : i32
    return %arg0, %c0_i32 : i32, i32
  }
  func.func @transform_2(%arg0: i32) -> (i32, i32) {
    %c0_i32 = arith.constant 0 : i32
    %c0_i32_0 = arith.constant 0 : i32
    return %arg0, %c0_i32 : i32, i32
  }
  func.func @transform_3(%arg0: i32) -> (i32, i32) {
    %c0_i32 = arith.constant 0 : i32
    %c0_i32_0 = arith.constant 0 : i32
    return %arg0, %c0_i32 : i32, i32
  }
  func.func @transform_4(%arg0: i32) -> (i32, i32) {
    %c0_i32 = arith.constant 0 : i32
    %c0_i32_0 = arith.constant 0 : i32
    return %arg0, %c0_i32 : i32, i32
  }
  func.func @transform_5(%arg0: i32) -> (i32, i32) {
    %c0_i32 = arith.constant 0 : i32
    %c0_i32_0 = arith.constant 0 : i32
    %c0_i32_1 = arith.constant 0 : i32
    return %c0_i32, %c0_i32_0 : i32, i32
  }
  func.func @transform_6(%arg0: i32) -> (i32, i32) {
    %c0_i32 = arith.constant 0 : i32
    %c0_i32_0 = arith.constant 0 : i32
    %c0_i32_1 = arith.constant 0 : i32
    return %c0_i32, %c0_i32_0 : i32, i32
  }
  func.func @transform_7(%arg0: i32) -> (i32, i32) {
    %c0_i32 = arith.constant 0 : i32
    %c0_i32_0 = arith.constant 0 : i32
    %c0_i32_1 = arith.constant 0 : i32
    return %c0_i32, %c0_i32_0 : i32, i32
  }
  func.func @transform_8(%arg0: i32) -> (i32, i32) {
    %c0_i32 = arith.constant 0 : i32
    %c0_i32_0 = arith.constant 0 : i32
    %c0_i32_1 = arith.constant 0 : i32
    return %c0_i32, %c0_i32_0 : i32, i32
  }
  func.func @transform_9(%arg0: i32) -> (i32, i32) {
    %c0_i32 = arith.constant 0 : i32
    %c0_i32_0 = arith.constant 0 : i32
    %c0_i32_1 = arith.constant 0 : i32
    return %c0_i32, %c0_i32_0 : i32, i32
  }
  func.func @transform_10(%arg0: i32) -> (i32, i32) {
    %c0_i32 = arith.constant 0 : i32
    %c0_i32_0 = arith.constant 0 : i32
    %c0_i32_1 = arith.constant 0 : i32
    return %c0_i32, %c0_i32_0 : i32, i32
  }
  func.func @transform_11(%arg0: i32) -> (i32, i32) {
    %c0_i32 = arith.constant 0 : i32
    %c0_i32_0 = arith.constant 0 : i32
    %c0_i32_1 = arith.constant 0 : i32
    return %c0_i32, %c0_i32_0 : i32, i32
  }
  func.func @transform_12(%arg0: i32) -> (i32, i32) {
    %c0_i32 = arith.constant 0 : i32
    %c0_i32_0 = arith.constant 0 : i32
    %c0_i32_1 = arith.constant 0 : i32
    return %c0_i32, %c0_i32_0 : i32, i32
  }
}

</mosaic_0001>

<bundles_post_ra>
// kernel: tpu_custom_call.1
= control target key start
LH: loop header
LB: loop body
LE: loop exit
PB: predicated region body
PF: predicated region fallthrough
CT: control target
= control target key end

     0   :  { %17 = vsyncpa [#allocation3], 0  ;;  %s2568_s0 = inlined_call_operand.hbm [shape: f32[8,1024], index: 0, kind: input, shape index: {}]   ;;  %s2569_s1 = inlined_call_operand.hbm [shape: f32[8,1024], index: 1, kind: input, shape index: {}]   ;;  %s2570_s2 = inlined_call_operand.vmem [shape: s32[8,1], index: 2, kind: input, shape index: {}]   ;;  %s2571_s3 = inlined_call_operand.vmem [shape: s32[8,1], index: 3, kind: input, shape index: {}]   ;;  %s2572_s4 = inlined_call_operand.vmem [shape: f32[8,1], index: 4, kind: input, shape index: {}]   ;;  %s2573_s5 = inlined_call_operand.vmem [shape: f32[1,512], index: 5, kind: input, shape index: {}]   ;;  %s2574_s6 = inlined_call_operand.vmem [shape: f32[1,512], index: 6, kind: input, shape index: {}]   ;;  %s2575_s7 = inlined_call_operand.hbm [shape: bf16[1024,128], index: 7, kind: input, shape index: {}]   ;;  %s2576_s8 = inlined_call_operand.hbm [shape: bf16[128,128], index: 8, kind: input, shape index: {}]   ;;  %s2577_s9 = inlined_call_operand.vmem [shape: f32[1,128], index: 9, kind: input, shape index: {}]   ;;  %s2578_s10 = inlined_call_operand.hbm [shape: bf16[128,1024], index: 10, kind: input, shape index: {}]   ;;  %s2579_s11 = inlined_call_operand.vmem [shape: f32[1,1024], index: 11, kind: input, shape index: {}]   ;;  %s2580_s12 = inlined_call_operand.hbm [shape: f32[1,1], index: 12, kind: output, shape index: {}]  }
   0x1   :  { %18 = vsyncpa [#allocation6], 0 }
   0x2   :  { %19 = vsyncpa [#allocation9], 0  ;;  %s37_s23 = sshll.u32 %s2569_s1, 4  ;;  %s38_s23 = int_to_ptr.hbm [resolvable:$true] %s37_s23 }
   0x3   :  { %20 = vsyncpa [#allocation4], 0  ;;  %s2386_s24 = smov [#allocation5]   ;;  %s70_s28 = sshll.u32 %s2576_s8, 4  ;;  %s71_s28 = int_to_ptr.hbm [resolvable:$true] %s70_s28 }
   0x4   :  { %s39_s25 = sshll.u32 %s2386_s24, 4  ;;  %s2387_s29 = smov [#allocation8]   ;;  %s40_s25 = int_to_ptr.vmem [resolvable:$true] %s39_s25 }
   0x5   :  { %42 = dma.hbm_to_vmem [thread:$0]  %s38_s23, 1024, %s40_s25, [#allocation6]  }
   0x6   :  { %s72_s30 = sshll.u32 %s2387_s29, 4  ;;  %s26_s15 = sshll.u32 %s2568_s0, 4  ;;  %s73_s30 = int_to_ptr.vmem [resolvable:$true] %s72_s30  ;;  %s27_s15 = int_to_ptr.hbm [resolvable:$true] %s26_s15 }
   0x7   :  { %s2388_s1 = smov 64   ;;  %s2389_s16 = smov 4  }
   0x8   :  { %78 = dma.hbm_to_vmem [thread:$0]  %s71_s28, 1024, %s73_s30, [#allocation9], %s2388_s1, %s2388_s1, %s2389_s16  }
   0x9   :  { %s57_s19 = sshll.u32 %s2575_s7, 4  ;;  %s2390_s20 = smov [#allocation2]   ;;  %s58_s19 = int_to_ptr.hbm [resolvable:$true] %s57_s19 }
   0xa   :  { %s28_s21 = sshll.u32 %s2390_s20, 4  ;;  %s2391_s8 = smov [#allocation7]   ;;  %s29_s21 = int_to_ptr.vmem [resolvable:$true] %s28_s21 }
   0xb   :  { %31 = dma.hbm_to_vmem [thread:$0]  %s27_s15, 1024, %s29_s21, [#allocation3]  }
   0xc   :  { %s59_s22 = sshll.u32 %s2391_s8, 4  ;;  %s85_s0 = sshll.u32 %s2578_s10, 4  ;;  %s60_s22 = int_to_ptr.vmem [resolvable:$true] %s59_s22  ;;  %s86_s0 = int_to_ptr.hbm [resolvable:$true] %s85_s0 }
   0xd   :  { %65 = dma.hbm_to_vmem [thread:$0]  %s58_s19, 8192, %s60_s22, [#allocation6], %s2388_s1, %s2388_s1, %s2389_s16  }
   0xe   :  { %s2392_s25 = smov [#allocation10]   ;;  %s2393_s27 = smov 512  }
   0xf   :  { %s87_s26 = sshll.u32 %s2392_s25, 4  ;;  %s2394_s28 = smov 32   ;;  %s88_s26 = int_to_ptr.vmem [resolvable:$true] %s87_s26 }
  0x10   :  { %93 = dma.hbm_to_vmem [thread:$0]  %s86_s0, 8192, %s88_s26, [#allocation9], %s2393_s27, %s2393_s27, %s2394_s28  }
  0x11   :  { %2378 = dma.done.wait [#allocation3], 1024  }
  0x12   :  { %2379 = vsyncadd [#allocation3], 4294966272 }
  0x13   :  { %2380 = dma.done.wait [#allocation6], 9216  }
  0x14   :  { %2381 = vsyncadd [#allocation6], 4294958080 }
  0x15   :  { %2382 = dma.done.wait [#allocation9], 9216  }
  0x16   :  { %2383 = vsyncadd [#allocation9], 4294958080  ;;  %v2395_v0 = vmov 0   ;;  %v132_v1 = vld [vmem:[%s2570_s2] sm:$0xff]  ;;  %v2150_v4 = vld [vmem:[#allocation8 + $0x38] sm:$0xff]  ;;  %v133_v23 = vlaneseq  ;;  %vm1502_vm6 = vcmask 0  }
  0x17   :  { %2229 = vset.pattern.permute.xlu0 %v2395_v0  ;;  %2230 = vset.pattern.permute.xlu1 %v2395_v0  ;;  %v207_v2 = vld [vmem:[%s2572_s4] sm:$0xff]  ;;  %v209_v5 = vcvt.s32.f32 %v132_v1  ;;  %v2149_v6 = vld [vmem:[#allocation8 + $0x30] sm:$0xff]  ;;  %v2148_v9 = vld [vmem:[#allocation8 + $0x28] sm:$0xff]  ;;  %vm1487_vm8 = vcmask 7168   ;;  %s2397_s16 = smov [#allocation11]   ;;  %s1522_s20 = sshll.u32 %s2580_s12, 4  ;;  %s1523_s20 = int_to_ptr.hbm [resolvable:$true] %s1522_s20 }
  0x18   :  { %139 = vperm.xlu0 %2229, %v132_v1   ;;  %v208_v3 = vsub.f32 1.0, %v207_v2  ;;  %431 = vmatpush.bf16.msra.mxu0 %v2150_v4  ;;  %v211_v7 = vld [vmem:[%s2571_s3] sm:$0xff]  ;;  %v2146_v11 = vld [vmem:[#allocation8 + $0x18] sm:$0xff]  ;;  %v2145_v12 = vld [vmem:[#allocation8 + $0x10] sm:$0xff]  ;;  %v2488_v28 = vand.u32 127, %v133_v23  ;;  %s1520_s17 = sshll.u32 %s2397_s16, 4  ;;  %s1521_s17 = int_to_ptr.vmem [resolvable:$true] %s1520_s17 }
  0x19   :  { %v210_v8 = vmul.f32 0.0025, %v209_v5  ;;  %v2147_v10 = vld [vmem:[#allocation8 + $0x20] sm:$0xff]  ;;  %v2144_v13 = vld [vmem:[#allocation8 + $0x8] sm:$0xff]  ;;  %v2086_v15 = vld [vmem:[#allocation7 + $0x38] sm:$0xff] }
  0x1a   :  { %218 = vperm.xlu1 %2230, %v208_v3   ;;  %v2143_v14 = vld [vmem:[#allocation8] sm:$0xff]  ;;  %v2094_v16 = vld [vmem:[#allocation7 + $0x78] sm:$0xff]  ;;  %828 = vmatpush.bf16.msra.mxu1 %v2086_v15  ;;  %v2085_v19 = vld [vmem:[#allocation7 + $0x30] sm:$0xff]  ;;  %v135_v34 = vadd.s32 128, %v2488_v28  ;;  %v136_v35 = vadd.s32 256, %v2488_v28  ;;  %v2501_v39 = vadd.s32 384, %v2488_v28 }
  0x1b   :  { %v2102_v17 = vld [vmem:[#allocation7 + $0xb8] sm:$0xff]  ;;  %841 = vmatpush.bf16.msra.mxu2 %v2094_v16  ;;  %v2093_v20 = vld [vmem:[#allocation7 + $0x70] sm:$0xff]  ;;  %v2084_v24 = vld [vmem:[#allocation7 + $0x28] sm:$0xff]  ;;  %vm222_vm4 = vcmp.eq.s32.totalorder %v2488_v28, 10 }
  0x1c   :  { %432 = vmatpush.bf16.msra.mxu0 %v2149_v6  ;;  %v2110_v18 = vld [vmem:[#allocation7 + $0xf8] sm:$0xff]  ;;  %854 = vmatpush.bf16.msra.mxu3 %v2102_v17  ;;  %v2101_v21 = vld [vmem:[#allocation7 + $0xb0] sm:$0xff]  ;;  %v2092_v25 = vld [vmem:[#allocation7 + $0x68] sm:$0xff] }
  0x1d   :  { %v2109_v22 = vld [vmem:[#allocation7 + $0xf0] sm:$0xff]  ;;  %v2100_v26 = vld [vmem:[#allocation7 + $0xa8] sm:$0xff]  ;;  %v145_v29 = vld [vmem:[%s2573_s5] sm:$0xf] }
  0x1e   :  { %829 = vmatpush.bf16.msra.mxu1 %v2085_v19  ;;  %v2108_v27 = vld [vmem:[#allocation7 + $0xe8] sm:$0xff]  ;;  %v2083_v30 = vld [vmem:[#allocation7 + $0x20] sm:$0xff]  ;;  %v147_v37 = vperm.slane %v145_v29, 0  ;;  %v148_v38 = vperm.slane %v145_v29, 1  ;;  %v2082_v40 = vld [vmem:[#allocation7 + $0x18] sm:$0xff]  ;;  %v149_v43 = vperm.slane %v145_v29, 2 }
  0x1f   :  { %842 = vmatpush.bf16.msra.mxu2 %v2093_v20  ;;  %v2091_v31 = vld [vmem:[#allocation7 + $0x60] sm:$0xff]  ;;  %v2090_v41 = vld [vmem:[#allocation7 + $0x58] sm:$0xff]  ;;  %v150_v49 = vperm.slane %v145_v29, 3  ;;  %v2081_v53 = vld [vmem:[#allocation7 + $0x10] sm:$0xff] }
  0x20   :  { %213 = vperm.xlu0 %2229, %v211_v7   ;;  %433 = vmatpush.bf16.msra.mxu0 %v2148_v9  ;;  %v2099_v32 = vld [vmem:[#allocation7 + $0xa0] sm:$0xff]  ;;  %v2098_v46 = vld [vmem:[#allocation7 + $0x98] sm:$0xff]  ;;  %v2089_v54 = vld [vmem:[#allocation7 + $0x50] sm:$0xff] }
  0x21   :  { %855 = vmatpush.bf16.msra.mxu3 %v2101_v21  ;;  %v2107_v33 = vld [vmem:[#allocation7 + $0xe0] sm:$0xff]  ;;  %v2106_v47 = vld [vmem:[#allocation7 + $0xd8] sm:$0xff]  ;;  %v2097_v58 = vld [vmem:[#allocation7 + $0x90] sm:$0xff] }
  0x22   :  { %225 = vperm.xlu1 %2230, %v210_v8   ;;  %830 = vmatpush.bf16.msra.mxu1 %v2084_v24  ;;  %v2498_v36 = vld [vmem:[%s2574_s6] sm:$0xf]  ;;  %v2105_v59 = vld [vmem:[#allocation7 + $0xd0] sm:$0xff]  ;;  %v2080_v1 = vld [vmem:[#allocation7 + $0x8] sm:$0xff] }
  0x23   :  { %843 = vmatpush.bf16.msra.mxu2 %v2092_v25  ;;  %v166_v44 = vperm.slane %v2498_v36, 0  ;;  %v167_v45 = vperm.slane %v2498_v36, 1  ;;  %v168_v62 = vperm.slane %v2498_v36, 2  ;;  %v2088_v2 = vld [vmem:[#allocation7 + $0x48] sm:$0xff]  ;;  %v169_v8 = vperm.slane %v2498_v36, 3  ;;  %v2095_v15 = vld [vmem:[#allocation7 + $0x80] sm:$0xff] }
  0x24   :  { %434 = vmatpush.bf16.msra.mxu0 %v2147_v10  ;;  %v2096_v4 = vld [vmem:[#allocation7 + $0x88] sm:$0xff]  ;;  %v2103_v16 = vld [vmem:[#allocation7 + $0xc0] sm:$0xff]  ;;  %v2118_v19 = vld [vmem:[#allocation7 + $0x138] sm:$0xff] }
  0x25   :  { %856 = vmatpush.bf16.msra.mxu3 %v2100_v26  ;;  %v2104_v5 = vld [vmem:[#allocation7 + $0xc8] sm:$0xff]  ;;  %v2126_v20 = vld [vmem:[#allocation7 + $0x178] sm:$0xff]  ;;  %v2117_v25 = vld [vmem:[#allocation7 + $0x130] sm:$0xff] }
  0x26   :  { %831 = vmatpush.bf16.msra.mxu1 %v2083_v30  ;;  %v2142_v24 = vld [vmem:[#allocation7 + $0x1f8] sm:$0xff]  ;;  %v2125_v26 = vld [vmem:[#allocation7 + $0x170] sm:$0xff]  ;;  %v2116_v29 = vld [vmem:[#allocation7 + $0x128] sm:$0xff] }
  0x27   :  { %844 = vmatpush.bf16.msra.mxu2 %v2091_v31  ;;  %v2124_v30 = vld [vmem:[#allocation7 + $0x168] sm:$0xff]  ;;  %v2139_v36 = vld [vmem:[#allocation7 + $0x1e0] sm:$0xff] }
  0x28   :  { %435 = vmatpush.bf16.msra.mxu0 %v2146_v11  ;;  %v2132_v31 = vld [vmem:[#allocation7 + $0x1a8] sm:$0xff] }
  0x29   :  { %857 = vmatpush.bf16.msra.mxu3 %v2099_v32  ;;  %v2140_v32 = vld [vmem:[#allocation7 + $0x1e8] sm:$0xff] }
  0x2a   :  { %832 = vmatpush.bf16.msra.mxu1 %v2082_v40  ;;  %v2138_v40 = vld [vmem:[#allocation7 + $0x1d8] sm:$0xff] }
  0x2b   :  { %845 = vmatpush.bf16.msra.mxu2 %v2090_v41  ;;  %v2113_v41 = vld [vmem:[#allocation7 + $0x110] sm:$0xff] }
  0x2c   :  { %436 = vmatpush.bf16.msra.mxu0 %v2145_v12  ;;  %v2079_v12 = vld [vmem:[#allocation7] sm:$0xff] }
  0x2d   :  { %858 = vmatpush.bf16.msra.mxu3 %v2098_v46  ;;  %v2120_v46 = vld [vmem:[#allocation7 + $0x148] sm:$0xff] }
  0x2e   :  { %833 = vmatpush.bf16.msra.mxu1 %v2081_v53 }
  0x2f   :  { %846 = vmatpush.bf16.msra.mxu2 %v2089_v54  ;;  %v116_v54 = vld [vmem:[#allocation2] sm:$0xff] }
  0x30   :  { %437 = vmatpush.bf16.msra.mxu0 %v2144_v13  ;;  %v2087_v13 = vld [vmem:[#allocation7 + $0x40] sm:$0xff] }
  0x31   :  { %859 = vmatpush.bf16.msra.mxu3 %v2097_v58  ;;  %v119_v58 = vld [vmem:[#allocation2 + $0x18] sm:$0xff] }
  0x32   :  { %834 = vmatpush.bf16.msra.mxu1 %v2080_v1 }
  0x33   :  { %847 = vmatpush.bf16.msra.mxu2 %v2088_v2 }
  0x34   :  { %438 = vmatpush.bf16.msra.mxu0 %v2143_v14 }
  0x35   :  { %860 = vmatpush.bf16.msra.mxu3 %v2096_v4 }
  0x36   :  { %835 = vmatpush.bf16.msra.mxu1 %v2079_v12 }
  0x37   :  { %848 = vmatpush.bf16.msra.mxu2 %v2087_v13 }
  0x38   :  { %867 = vmatpush.bf16.msrb.mxu0 %v2110_v18 }
  0x39   :  { %861 = vmatpush.bf16.msra.mxu3 %v2095_v15 }
  0x3a   :  { %880 = vmatpush.bf16.msrb.mxu1 %v2118_v19  ;;  %v2537_v19 = vld [vmem:[#allocation5 + $0x38] sm:$0xff] }
  0x3b   :  { %893 = vmatpush.bf16.msrb.mxu2 %v2126_v20  ;;  %v120_v20 = vld [vmem:[#allocation2 + $0x20] sm:$0xff] }
  0x3c   :  { %868 = vmatpush.bf16.msrb.mxu0 %v2109_v22  ;;  %v2134_v22 = vld [vmem:[#allocation7 + $0x1b8] sm:$0xff] }
  0x3d   :  { %906 = vmatpush.bf16.msrb.mxu3 %v2134_v22 }
  0x3e   :  { %881 = vmatpush.bf16.msrb.mxu1 %v2117_v25  ;;  %v122_v25 = vld [vmem:[#allocation2 + $0x30] sm:$0xff] }
  0x3f   :  { %894 = vmatpush.bf16.msrb.mxu2 %v2125_v26  ;;  %v123_v26 = vld [vmem:[#allocation2 + $0x38] sm:$0xff] }
  0x40   :  { %869 = vmatpush.bf16.msrb.mxu0 %v2108_v27  ;;  %v2133_v27 = vld [vmem:[#allocation7 + $0x1b0] sm:$0xff] }
  0x41   :  { %907 = vmatpush.bf16.msrb.mxu3 %v2133_v27 }
  0x42   :  { %882 = vmatpush.bf16.msrb.mxu1 %v2116_v29 }
  0x43   :  { %895 = vmatpush.bf16.msrb.mxu2 %v2124_v30 }
  0x44   :  { %870 = vmatpush.bf16.msrb.mxu0 %v2107_v33  ;;  %v2115_v33 = vld [vmem:[#allocation7 + $0x120] sm:$0xff] }
  0x45   :  { %908 = vmatpush.bf16.msrb.mxu3 %v2132_v31 }
  0x46   :  { %883 = vmatpush.bf16.msrb.mxu1 %v2115_v33 }
  0x48   :  { %871 = vmatpush.bf16.msrb.mxu0 %v2106_v47  ;;  %v2128_v47 = vld [vmem:[#allocation7 + $0x188] sm:$0xff] }
  0x4c   :  { %872 = vmatpush.bf16.msrb.mxu0 %v2105_v59  ;;  %v2519_v59 = vld [vmem:[#allocation5 + $0x8] sm:$0xff] }
  0x50   :  { %873 = vmatpush.bf16.msrb.mxu0 %v2104_v5 }
  0x54   :  { %874 = vmatpush.bf16.msrb.mxu0 %v2103_v16  ;;  %v2531_v16 = vld [vmem:[#allocation5 + $0x20] sm:$0xff] }
  0x8a   :  { %v140_v42 = vpop.permute.xlu0 %139 }
  0x8b   :  { %vm141_vm0 = vcmp.eq.s32.totalorder %v2488_v28, %v140_v42  ;;  %vm142_vm1 = vcmp.eq.s32.totalorder %v135_v34, %v140_v42  ;;  %vm143_vm2 = vcmp.eq.s32.totalorder %v136_v35, %v140_v42  ;;  %vm144_vm3 = vcmp.eq.s32.totalorder %v2501_v39, %v140_v42  ;;  %v2123_v34 = vld [vmem:[#allocation7 + $0x160] sm:$0xff]  ;;  %v2130_v39 = vld [vmem:[#allocation7 + $0x198] sm:$0xff]  ;;  %v2121_v42 = vld [vmem:[#allocation7 + $0x150] sm:$0xff] }
  0x8c   :  { %v219_v48 = vpop.permute.xlu1 %218  ;;  %v155_v50 = vsel %vm141_vm0, %v147_v37, 0.0  ;;  %v156_v51 = vsel %vm142_vm1, %v148_v38, 0.0  ;;  %v157_v55 = vsel %vm143_vm2, %v149_v43, 0.0  ;;  %v174_v56 = vsel %vm141_vm0, %v166_v44, 0.0  ;;  %v2131_v35 = vld [vmem:[#allocation7 + $0x1a0] sm:$0xff]  ;;  %896 = vmatpush.bf16.msrb.mxu2 %v2123_v34  ;;  %v2114_v37 = vld [vmem:[#allocation7 + $0x118] sm:$0xff] }
  0x8d   :  { %v159_v52 = vadd.f32 %v156_v51, %v155_v50  ;;  %v175_v57 = vsel %vm142_vm1, %v167_v45, 0.0  ;;  %v158_v61 = vsel %vm144_vm3, %v150_v49, 0.0  ;;  %v176_v9 = vsel %vm143_vm2, %v168_v62, 0.0  ;;  %909 = vmatpush.bf16.msrb.mxu3 %v2131_v35  ;;  %v2122_v38 = vld [vmem:[#allocation7 + $0x158] sm:$0xff]  ;;  %884 = vmatpush.bf16.msrb.mxu1 %v2114_v37  ;;  %v2129_v43 = vld [vmem:[#allocation7 + $0x190] sm:$0xff]  ;;  %v2112_v45 = vld [vmem:[#allocation7 + $0x108] sm:$0xff] }
  0x8e   :  { %v178_v0 = vadd.f32 %v175_v57, %v174_v56  ;;  %v177_v18 = vsel %vm144_vm3, %v169_v8, 0.0  ;;  %v2137_v44 = vld [vmem:[#allocation7 + $0x1d0] sm:$0xff]  ;;  %v2111_v49 = vld [vmem:[#allocation7 + $0x100] sm:$0xff] }
  0x8f   :  { %v160_v60 = vadd.f32 %v159_v52, %v157_v55  ;;  %v2119_v50 = vld [vmem:[#allocation7 + $0x140] sm:$0xff]  ;;  %v117_v55 = vld [vmem:[#allocation2 + $0x8] sm:$0xff]  ;;  %v118_v57 = vld [vmem:[#allocation2 + $0x10] sm:$0xff] }
  0x90   :  { %v179_v11 = vadd.f32 %v178_v0, %v176_v9  ;;  %897 = vmatpush.bf16.msrb.mxu2 %v2122_v38  ;;  %v2127_v51 = vld [vmem:[#allocation7 + $0x180] sm:$0xff] }
  0x91   :  { %v161_v63 = vadd.f32 %v160_v60, %v158_v61  ;;  %910 = vmatpush.bf16.msrb.mxu3 %v2130_v39  ;;  %885 = vmatpush.bf16.msrb.mxu1 %v2113_v41  ;;  %v2135_v52 = vld [vmem:[#allocation7 + $0x1c0] sm:$0xff]  ;;  %v2521_v60 = vld [vmem:[#allocation5 + $0x10] sm:$0xff]  ;;  %v2523_v61 = vld [vmem:[#allocation5 + $0x18] sm:$0xff] }
  0x92   :  { %v214_v3 = vpop.permute.xlu0 %213  ;;  %v180_v21 = vadd.f32 %v179_v11, %v177_v18  ;;  %v2517_v56 = vld [vmem:[#allocation5] sm:$0xff]  ;;  %v2535_v18 = vld [vmem:[#allocation5 + $0x30] sm:$0xff] }
  0x93   :  { %vm215_vm5 = vcmp.eq.s32.totalorder %v2488_v28, %v214_v3  ;;  %162 = vadd.xlane.f32.xlu2 %v161_v63  ;;  %v2141_v28 = vld [vmem:[#allocation7 + $0x1f0] sm:$0xff] }
  0x94   :  { %v221_v6 = vsel %vm215_vm5, %v219_v48, 0.0  ;;  %v226_v7 = vpop.permute.xlu1 %225  ;;  %898 = vmatpush.bf16.msrb.mxu2 %v2121_v42  ;;  %v2136_v48 = vld [vmem:[#allocation7 + $0x1c8] sm:$0xff]  ;;  %v2048_v42 = vld [vmem:[#allocation10 + $0x1c0] sm:$0xf] }
  0x95   :  { %v228_v10 = vsel %vm222_vm4, %v226_v7, 0.0  ;;  %911 = vmatpush.bf16.msrb.mxu3 %v2129_v43  ;;  %886 = vmatpush.bf16.msrb.mxu1 %v2112_v45  ;;  %v2211_v43 = vld [vmem:[#allocation10 + $0x1dc] sm:$0xf0] }
  0x96   :  { %v229_v14 = vadd.f32 %v228_v10, %v221_v6  ;;  %v2049_v45 = vor.u32 %v2211_v43, %v2048_v42  ;;  %v2180_v43 = vld [vmem:[#allocation10 + $0xe4] sm:$0xf0] }
  0x98   :  { %v366_v17 = vpack.c.bf16 %v229_v14, %v229_v14  ;;  %899 = vmatpush.bf16.msrb.mxu2 %v2120_v46  ;;  %v2050_v46 = vld [vmem:[#allocation10 + $0x1e0] sm:$0xf0] }
  0x99   :  { %912 = vmatpush.bf16.msrb.mxu3 %v2128_v47  ;;  %887 = vmatpush.bf16.msrb.mxu1 %v2111_v49  ;;  %v2056_v47 = vld [vmem:[#allocation10 + $0x1c8] sm:$0xf] }
  0x9a   :  { %439 = vmatmul.bf16.vlgmr.msra.gmra.mxu0 %v366_v17  ;;  %v2533_v17 = vld [vmem:[#allocation5 + $0x28] sm:$0xff] }
  0x9b   :  { %181 = vadd.xlane.f32.xlu2 %v180_v21  ;;  %919 = vmatpush.bf16.msra.mxu0 %v2142_v24  ;;  %v121_v21 = vld [vmem:[#allocation2 + $0x28] sm:$0xff] }
  0x9c   :  { %900 = vmatpush.bf16.msrb.mxu2 %v2119_v50 }
  0x9d   :  { %913 = vmatpush.bf16.msrb.mxu3 %v2127_v51  ;;  %v2208_v51 = vld [vmem:[#allocation10 + $0x1cc] sm:$0xf] }
  0x9f   :  { %920 = vmatpush.bf16.msra.mxu0 %v2141_v28 }
  0xa3   :  { %921 = vmatpush.bf16.msra.mxu0 %v2140_v32 }
  0xa7   :  { %922 = vmatpush.bf16.msra.mxu0 %v2139_v36 }
  0xab   :  { %923 = vmatpush.bf16.msra.mxu0 %v2138_v40 }
  0xaf   :  { %924 = vmatpush.bf16.msra.mxu0 %v2137_v44  ;;  %v2207_v44 = vld [vmem:[#allocation10 + $0x1c4] sm:$0xf] }
  0xb0   :  { %v2053_v49 = vor.u32 %v2207_v44, %v2050_v46  ;;  %v2176_v44 = vld [vmem:[#allocation10 + $0xcc] sm:$0xf] }
  0xb3   :  { %925 = vmatpush.bf16.msra.mxu0 %v2136_v48  ;;  %v2212_v48 = vld [vmem:[#allocation10 + $0x1e4] sm:$0xf0] }
  0xb4   :  { %v2057_v50 = vor.u32 %v2212_v48, %v2056_v47  ;;  %v1888_v48 = vld [vmem:[#allocation10 + $0x80] sm:$0xf] }
  0xb7   :  { %926 = vmatpush.bf16.msra.mxu0 %v2135_v52  ;;  %v2058_v52 = vld [vmem:[#allocation10 + $0x1e8] sm:$0xf0] }
 0x106   :  { %v163_v53 = vpop.xlane.xlu2 %162 }
 0x107   :  { %v183_v63 = vmul.f32 %v163_v53, %v116_v54  ;;  %v184_v0 = vmul.f32 %v163_v53, %v117_v55  ;;  %v185_v1 = vmul.f32 %v163_v53, %v118_v57  ;;  %v186_v2 = vmul.f32 %v163_v53, %v119_v58  ;;  %v2016_v54 = vld [vmem:[#allocation10 + $0x180] sm:$0xf]  ;;  %v2199_v57 = vld [vmem:[#allocation10 + $0x184] sm:$0xf] }
 0x108   :  { %v187_v29 = vmul.f32 %v163_v53, %v120_v20  ;;  %v188_v30 = vmul.f32 %v163_v53, %v121_v21  ;;  %v189_v31 = vmul.f32 %v163_v53, %v122_v25  ;;  %v190_v32 = vmul.f32 %v163_v53, %v123_v26  ;;  %v2203_v55 = vld [vmem:[#allocation10 + $0x19c] sm:$0xf0]  ;;  %v1994_v21 = vld [vmem:[#allocation10 + $0x168] sm:$0xf0]  ;;  %v2183_v26 = vld [vmem:[#allocation10 + $0x104] sm:$0xf] }
 0x109   :  { %v2061_v53 = vor.u32 %v2208_v51, %v2058_v52  ;;  %v2017_v58 = vor.u32 %v2203_v55, %v2016_v54  ;;  %v2187_v25 = vld [vmem:[#allocation10 + $0x11c] sm:$0xf0]  ;;  %v1896_v54 = vld [vmem:[#allocation10 + $0x88] sm:$0xf] }
 0x10a   :  { %v2172_v55 = vld [vmem:[#allocation10 + $0xa4] sm:$0xf0] }
 0x10e   :  { %v182_v62 = vpop.xlane.xlu2 %181 }
 0x10f   :  { %v191_v3 = vmul.f32 %v182_v62, %v2517_v56  ;;  %v192_v4 = vmul.f32 %v182_v62, %v2519_v59  ;;  %v193_v5 = vmul.f32 %v182_v62, %v2521_v60  ;;  %v194_v6 = vmul.f32 %v182_v62, %v2523_v61 }
 0x110   :  { %v195_v22 = vmul.f32 %v182_v62, %v2531_v16  ;;  %v196_v24 = vmul.f32 %v182_v62, %v2533_v17  ;;  %v197_v27 = vmul.f32 %v182_v62, %v2535_v18  ;;  %v198_v28 = vmul.f32 %v182_v62, %v2537_v19  ;;  %v2018_v62 = vld [vmem:[#allocation10 + $0x1a0] sm:$0xf0] }
 0x111   :  { %v199_v7 = vadd.f32 %v191_v3, %v183_v63  ;;  %v200_v8 = vadd.f32 %v192_v4, %v184_v0  ;;  %v201_v9 = vadd.f32 %v193_v5, %v185_v1  ;;  %v202_v10 = vadd.f32 %v194_v6, %v186_v2  ;;  %v2024_v63 = vld [vmem:[#allocation10 + $0x188] sm:$0xf]  ;;  %v2200_v3 = vld [vmem:[#allocation10 + $0x18c] sm:$0xf]  ;;  %v1984_v5 = vld [vmem:[#allocation10 + $0x140] sm:$0xf] }
 0x112   :  { %v203_v34 = vadd.f32 %v195_v22, %v187_v29  ;;  %v204_v35 = vadd.f32 %v196_v24, %v188_v30  ;;  %v205_v36 = vadd.f32 %v197_v27, %v189_v31  ;;  %v206_v37 = vadd.f32 %v198_v28, %v190_v32  ;;  %v2204_v0 = vld [vmem:[#allocation10 + $0x1a4] sm:$0xf0]  ;;  %v2026_v4 = vld [vmem:[#allocation10 + $0x1a8] sm:$0xf0]  ;;  %v1952_v24 = vld [vmem:[#allocation10 + $0x100] sm:$0xf] }
 0x113   :  { %v230_v11 = vpack.c.bf16 %v199_v7, %v199_v7  ;;  %v231_v12 = vpack.c.bf16 %v200_v8, %v200_v8  ;;  %v232_v13 = vpack.c.bf16 %v201_v9, %v201_v9  ;;  %v233_v14 = vpack.c.bf16 %v202_v10, %v202_v10  ;;  %v2195_v7 = vld [vmem:[#allocation10 + $0x15c] sm:$0xf0]  ;;  %v2191_v8 = vld [vmem:[#allocation10 + $0x144] sm:$0xf]  ;;  %v1960_v29 = vld [vmem:[#allocation10 + $0x108] sm:$0xf] }
 0x114   :  { %v234_v38 = vpack.c.bf16 %v203_v34, %v203_v34  ;;  %v235_v39 = vpack.c.bf16 %v204_v35, %v204_v35  ;;  %v236_v40 = vpack.c.bf16 %v205_v36, %v205_v36  ;;  %v237_v41 = vpack.c.bf16 %v206_v37, %v206_v37  ;;  %v1986_v9 = vld [vmem:[#allocation10 + $0x160] sm:$0xf0]  ;;  %v2188_v30 = vld [vmem:[#allocation10 + $0x124] sm:$0xf0]  ;;  %v1962_v34 = vld [vmem:[#allocation10 + $0x128] sm:$0xf0] }
 0x115   :  { %836 = vmatmul.bf16.vlgmr.msra.gmra.mxu1 %v230_v11  ;;  %849 = vmatmul.bf16.vlgmr.msra.gmra.mxu2 %v231_v12  ;;  %v2021_v1 = vor.u32 %v2199_v57, %v2018_v62  ;;  %v2025_v2 = vor.u32 %v2204_v0, %v2024_v63  ;;  %v2029_v6 = vor.u32 %v2200_v3, %v2026_v4  ;;  %v1992_v12 = vld [vmem:[#allocation10 + $0x148] sm:$0xf]  ;;  %v1954_v28 = vld [vmem:[#allocation10 + $0x120] sm:$0xf0]  ;;  %v1920_v36 = vld [vmem:[#allocation10 + $0xc0] sm:$0xf] }
 0x116   :  { %862 = vmatmul.bf16.vlgmr.msra.gmra.mxu3 %v232_v13  ;;  %875 = vmatmul.bf16.vlgmr.msrb.gmra.mxu0 %v233_v14  ;;  %v1985_v10 = vor.u32 %v2195_v7, %v1984_v5  ;;  %v1989_v11 = vor.u32 %v2191_v8, %v1986_v9  ;;  %v2196_v13 = vld [vmem:[#allocation10 + $0x164] sm:$0xf0]  ;;  %v2192_v14 = vld [vmem:[#allocation10 + $0x14c] sm:$0xf]  ;;  %v1953_v27 = vor.u32 %v2187_v25, %v1952_v24  ;;  %v2179_v37 = vld [vmem:[#allocation10 + $0xdc] sm:$0xf0] }
 0x117   :  { %v2529_v15 = vpop.f32.mrf.mxu0  ;;  %1349 = vmatpush.bf16.msra.mxu1 %v2049_v45  ;;  %1362 = vmatpush.bf16.msra.mxu2 %v2053_v49  ;;  %v1993_v20 = vor.u32 %v2196_v13, %v1992_v12  ;;  %v1997_v22 = vor.u32 %v2192_v14, %v1994_v21  ;;  %v1957_v31 = vor.u32 %v2183_v26, %v1954_v28  ;;  %v1930_v45 = vld [vmem:[#allocation10 + $0xe8] sm:$0xf0]  ;;  %v2171_v49 = vld [vmem:[#allocation10 + $0x9c] sm:$0xf0]  ;;  %v2159_v4 = vld [vmem:[#allocation10 + $0x44] sm:$0xf] }
 0x118   :  { %1375 = vmatpush.bf16.msra.mxu3 %v2057_v50  ;;  %1388 = vmatpush.bf16.msrb.mxu0 %v2061_v53  ;;  %v1961_v32 = vor.u32 %v2188_v30, %v1960_v29  ;;  %v1933_v47 = vor.u32 %v2176_v44, %v1930_v45  ;;  %v2167_v50 = vld [vmem:[#allocation10 + $0x84] sm:$0xf]  ;;  %v1889_v52 = vor.u32 %v2171_v49, %v1888_v48  ;;  %v2168_v63 = vld [vmem:[#allocation10 + $0x8c] sm:$0xf]  ;;  %v2163_v3 = vld [vmem:[#allocation10 + $0x5c] sm:$0xf0] }
 0x119   :  { %v1890_v53 = vld [vmem:[#allocation10 + $0xa0] sm:$0xf0]  ;;  %v1897_v62 = vor.u32 %v2172_v55, %v1896_v54  ;;  %v1898_v0 = vld [vmem:[#allocation10 + $0xa8] sm:$0xf0]  ;;  %v1864_v7 = vld [vmem:[#allocation10 + $0x48] sm:$0xf] }
 0x11a   :  { %v2164_v8 = vld [vmem:[#allocation10 + $0x64] sm:$0xf0]  ;;  %v1866_v12 = vld [vmem:[#allocation10 + $0x68] sm:$0xf0]  ;;  %v1824_v21 = vld [vmem:[#allocation10] sm:$0xf] }
 0x11b   :  { %1350 = vmatpush.bf16.msra.mxu1 %v2017_v58  ;;  %1363 = vmatpush.bf16.msra.mxu2 %v2021_v1  ;;  %v1893_v58 = vor.u32 %v2167_v50, %v1890_v53  ;;  %v1901_v1 = vor.u32 %v2168_v63, %v1898_v0  ;;  %v2151_v24 = vld [vmem:[#allocation10 + $0x4] sm:$0xf]  ;;  %v1832_v28 = vld [vmem:[#allocation10 + $0x8] sm:$0xf]  ;;  %v2072_v44 = vld [vmem:[#allocation10 + $0x1d8] sm:$0xf] }
 0x11c   :  { %1376 = vmatpush.bf16.msra.mxu3 %v2025_v2  ;;  %1389 = vmatpush.bf16.msrb.mxu0 %v2029_v6  ;;  %v1856_v2 = vld [vmem:[#allocation10 + $0x40] sm:$0xf]  ;;  %v1858_v6 = vld [vmem:[#allocation10 + $0x60] sm:$0xf0]  ;;  %v2156_v29 = vld [vmem:[#allocation10 + $0x24] sm:$0xf0] }
 0x11d   :  { %v1857_v5 = vor.u32 %v2163_v3, %v1856_v2  ;;  %v1861_v9 = vor.u32 %v2159_v4, %v1858_v6  ;;  %v2214_v45 = vld [vmem:[#allocation10 + $0x1f4] sm:$0xf0]  ;;  %v2032_v48 = vld [vmem:[#allocation10 + $0x190] sm:$0xf]  ;;  %v2034_v53 = vld [vmem:[#allocation10 + $0x1b0] sm:$0xf0] }
 0x11e   :  { %v2205_v49 = vld [vmem:[#allocation10 + $0x1ac] sm:$0xf0]  ;;  %v2040_v54 = vld [vmem:[#allocation10 + $0x198] sm:$0xf]  ;;  %v2202_v63 = vld [vmem:[#allocation10 + $0x19c] sm:$0xf] }
 0x11f   :  { %v442_v33 = vpop.f32.mrf.mxu0  ;;  %1351 = vmatpush.bf16.msra.mxu1 %v1985_v10  ;;  %1364 = vmatpush.bf16.msra.mxu2 %v1989_v11  ;;  %v1865_v10 = vor.u32 %v2164_v8, %v1864_v7  ;;  %v2160_v11 = vld [vmem:[#allocation10 + $0x4c] sm:$0xf]  ;;  %v2042_v0 = vld [vmem:[#allocation10 + $0x1b8] sm:$0xf0]  ;;  %v2000_v6 = vld [vmem:[#allocation10 + $0x150] sm:$0xf] }
 0x120   :  { %1377 = vmatpush.bf16.msra.mxu3 %v1993_v20  ;;  %1390 = vmatpush.bf16.msrb.mxu0 %v1997_v22  ;;  %v2184_v33 = vld [vmem:[#allocation10 + $0x10c] sm:$0xf]  ;;  %v1869_v14 = vor.u32 %v2160_v11, %v1866_v12  ;;  %v2155_v22 = vld [vmem:[#allocation10 + $0x1c] sm:$0xf0]  ;;  %v2045_v4 = vor.u32 %v2202_v63, %v2042_v0  ;;  %v2197_v7 = vld [vmem:[#allocation10 + $0x16c] sm:$0xf0] }
 0x121   :  { %v1965_v35 = vor.u32 %v2184_v33, %v1962_v34  ;;  %v1825_v26 = vor.u32 %v2155_v22, %v1824_v21  ;;  %v1833_v33 = vor.u32 %v2156_v29, %v1832_v28  ;;  %v2152_v34 = vld [vmem:[#allocation10 + $0xc] sm:$0xf]  ;;  %v2193_v8 = vld [vmem:[#allocation10 + $0x154] sm:$0xf]  ;;  %v2008_v12 = vld [vmem:[#allocation10 + $0x158] sm:$0xf] }
 0x122   :  { %v2002_v11 = vld [vmem:[#allocation10 + $0x170] sm:$0xf0]  ;;  %v2194_v22 = vld [vmem:[#allocation10 + $0x15c] sm:$0xf]  ;;  %v2173_v63 = vld [vmem:[#allocation10 + $0xac] sm:$0xf0] }
 0x123   :  { %1352 = vmatpush.bf16.msra.mxu1 %v1953_v27  ;;  %1365 = vmatpush.bf16.msra.mxu2 %v1957_v31  ;;  %v1826_v27 = vld [vmem:[#allocation10 + $0x20] sm:$0xf0]  ;;  %v2185_v28 = vld [vmem:[#allocation10 + $0x114] sm:$0xf] }
 0x124   :  { %1378 = vmatpush.bf16.msra.mxu3 %v1961_v32  ;;  %1391 = vmatpush.bf16.msrb.mxu0 %v1965_v35  ;;  %v1829_v32 = vor.u32 %v2151_v24, %v1826_v27  ;;  %v1834_v35 = vld [vmem:[#allocation10 + $0x28] sm:$0xf0]  ;;  %v2189_v27 = vld [vmem:[#allocation10 + $0x12c] sm:$0xf0]  ;;  %v2169_v0 = vld [vmem:[#allocation10 + $0x94] sm:$0xf] }
 0x125   :  { %888 = vmatmul.bf16.vlgmr.msrb.gmra.mxu1 %v234_v38  ;;  %901 = vmatmul.bf16.vlgmr.msrb.gmra.mxu2 %v235_v39  ;;  %v1921_v38 = vor.u32 %v2179_v37, %v1920_v36  ;;  %v2175_v39 = vld [vmem:[#allocation10 + $0xc4] sm:$0xf]  ;;  %v2064_v36 = vld [vmem:[#allocation10 + $0x1d0] sm:$0xf]  ;;  %v1837_v37 = vor.u32 %v2152_v34, %v1834_v35 }
 0x126   :  { %914 = vmatmul.bf16.vlgmr.msrb.gmra.mxu3 %v236_v40  ;;  %927 = vmatmul.bf16.vlgmr.msra.gmra.mxu0 %v237_v41  ;;  %v1922_v40 = vld [vmem:[#allocation10 + $0xe0] sm:$0xf0]  ;;  %v1928_v41 = vld [vmem:[#allocation10 + $0xc8] sm:$0xf] }
 0x127   :  { %v1925_v42 = vor.u32 %v2175_v39, %v1922_v40  ;;  %1353 = vmatpush.bf16.msra.mxu1 %v1921_v38  ;;  %v1929_v46 = vor.u32 %v2180_v43, %v1928_v41  ;;  %v2213_v38 = vld [vmem:[#allocation10 + $0x1ec] sm:$0xf0]  ;;  %v2209_v39 = vld [vmem:[#allocation10 + $0x1d4] sm:$0xf] }
 0x128   :  { %1392 = vmatpush.bf16.msrb.mxu0 %v1933_v47  ;;  %v2066_v40 = vld [vmem:[#allocation10 + $0x1f0] sm:$0xf0]  ;;  %v2074_v47 = vld [vmem:[#allocation10 + $0x1f8] sm:$0xf0] }
 0x129   :  { %1366 = vmatpush.bf16.msra.mxu2 %v1925_v42  ;;  %1379 = vmatpush.bf16.msra.mxu3 %v1929_v46  ;;  %v2065_v42 = vor.u32 %v2213_v38, %v2064_v36  ;;  %v2069_v43 = vor.u32 %v2209_v39, %v2066_v40  ;;  %v2210_v46 = vld [vmem:[#allocation10 + $0x1dc] sm:$0xf]  ;;  %v2231_v40 = vld [vmem:[%s2577_s9] ss:$0 sm:$0xff] }
 0x12a   :  { %v2077_v50 = vor.u32 %v2210_v46, %v2074_v47  ;;  %v1978_v38 = vld [vmem:[#allocation10 + $0x138] sm:$0xf0] }
 0x12b   :  { %1354 = vmatpush.bf16.msra.mxu1 %v1889_v52  ;;  %v2201_v52 = vld [vmem:[#allocation10 + $0x194] sm:$0xf] }
 0x12c   :  { %1393 = vmatpush.bf16.msrb.mxu0 %v1901_v1 }
 0x12d   :  { %1367 = vmatpush.bf16.msra.mxu2 %v1893_v58  ;;  %1380 = vmatpush.bf16.msra.mxu3 %v1897_v62  ;;  %v2037_v58 = vor.u32 %v2201_v52, %v2034_v53  ;;  %v2206_v62 = vld [vmem:[#allocation10 + $0x1b4] sm:$0xf0]  ;;  %v2178_v53 = vld [vmem:[#allocation10 + $0xdc] sm:$0xf] }
 0x12e   :  { %v2041_v3 = vor.u32 %v2206_v62, %v2040_v54  ;;  %v1946_v54 = vld [vmem:[#allocation10 + $0xf8] sm:$0xf0] }
 0x12f   :  { %1355 = vmatpush.bf16.msra.mxu1 %v1857_v5  ;;  %v1949_v62 = vor.u32 %v2178_v53, %v1946_v54 }
 0x130   :  { %1394 = vmatpush.bf16.msrb.mxu0 %v1869_v14  ;;  %v2005_v14 = vor.u32 %v2193_v8, %v2002_v11  ;;  %v1914_v8 = vld [vmem:[#allocation10 + $0xb8] sm:$0xf0] }
 0x131   :  { %1368 = vmatpush.bf16.msra.mxu2 %v1861_v9  ;;  %1381 = vmatpush.bf16.msra.mxu3 %v1865_v10  ;;  %v2001_v10 = vor.u32 %v2197_v7, %v2000_v6 }
 0x133   :  { %1356 = vmatpush.bf16.msra.mxu1 %v1825_v26  ;;  %v1968_v26 = vld [vmem:[#allocation10 + $0x110] sm:$0xf] }
 0x134   :  { %1395 = vmatpush.bf16.msrb.mxu0 %v1837_v37  ;;  %v2186_v37 = vld [vmem:[#allocation10 + $0x11c] sm:$0xf] }
 0x135   :  { %1369 = vmatpush.bf16.msra.mxu2 %v1829_v32  ;;  %1382 = vmatpush.bf16.msra.mxu3 %v1833_v33  ;;  %v1976_v32 = vld [vmem:[#allocation10 + $0x118] sm:$0xf] }
 0x136   :  { %v2190_v33 = vld [vmem:[#allocation10 + $0x134] sm:$0xf0] }
 0x137   :  { %1401 = vmatpush.bf16.msrb.mxu1 %v2065_v42  ;;  %v1977_v36 = vor.u32 %v2190_v33, %v1976_v32  ;;  %v2157_v33 = vld [vmem:[#allocation10 + $0x2c] sm:$0xf0] }
 0x138   :  { %1440 = vmatpush.bf16.msra.mxu0 %v2077_v50  ;;  %v2182_v50 = vld [vmem:[#allocation10 + $0xf4] sm:$0xf0] }
 0x139   :  { %1414 = vmatpush.bf16.msrb.mxu2 %v2069_v43  ;;  %v1936_v43 = vld [vmem:[#allocation10 + $0xd0] sm:$0xf] }
 0x13c   :  { %1441 = vmatpush.bf16.msra.mxu0 %v2045_v4  ;;  %v2170_v4 = vld [vmem:[#allocation10 + $0x9c] sm:$0xf] }
 0x13d   :  { %1415 = vmatpush.bf16.msrb.mxu2 %v2037_v58 }
 0x141   :  { %1416 = vmatpush.bf16.msrb.mxu2 %v2005_v14  ;;  %v1874_v14 = vld [vmem:[#allocation10 + $0x70] sm:$0xf0] }
 0x192   :  { %v837_v51 = vpop.f32.mrf.mxu1 }
 0x193   :  { %v2543_v57 = vpop.f32.mrf.mxu0  ;;  %v838_v30 = vadd.f32 %v837_v51, %v2529_v15  ;;  %v2073_v15 = vor.u32 %v2214_v45, %v2072_v44  ;;  %v2033_v51 = vor.u32 %v2205_v49, %v2032_v48  ;;  %v2181_v44 = vld [vmem:[#allocation10 + $0xec] sm:$0xf0]  ;;  %v2177_v45 = vld [vmem:[#allocation10 + $0xd4] sm:$0xf]  ;;  %v1944_v49 = vld [vmem:[#allocation10 + $0xd8] sm:$0xf] }
 0x194   :  { %v1937_v47 = vor.u32 %v2181_v44, %v1936_v43  ;;  %v1938_v48 = vld [vmem:[#allocation10 + $0xf0] sm:$0xf0]  ;;  %v1945_v52 = vor.u32 %v2182_v50, %v1944_v49 }
 0x195   :  { %1427 = vmatpush.bf16.msrb.mxu3 %v2073_v15  ;;  %1402 = vmatpush.bf16.msrb.mxu1 %v2033_v51  ;;  %v1941_v51 = vor.u32 %v2177_v45, %v1938_v48 }
 0x198   :  { %v850_v13 = vpop.f32.mrf.mxu2 }
 0x199   :  { %v863_v20 = vpop.f32.mrf.mxu3  ;;  %v851_v41 = vadd.f32 %v850_v13, %v838_v30  ;;  %v2198_v13 = vld [vmem:[#allocation10 + $0x174] sm:$0xf0]  ;;  %1428 = vmatpush.bf16.msrb.mxu3 %v2041_v3  ;;  %1403 = vmatpush.bf16.msrb.mxu1 %v2001_v10  ;;  %v1969_v30 = vor.u32 %v2189_v27, %v1968_v26  ;;  %v1872_v10 = vld [vmem:[#allocation10 + $0x50] sm:$0xf]  ;;  %v2162_v26 = vld [vmem:[#allocation10 + $0x5c] sm:$0xf] }
 0x19a   :  { %v839_v25 = vpop.f32.mrf.mxu1  ;;  %v2009_v21 = vor.u32 %v2198_v13, %v2008_v12  ;;  %v2174_v3 = vld [vmem:[#allocation10 + $0xb4] sm:$0xf0]  ;;  %v2165_v13 = vld [vmem:[#allocation10 + $0x6c] sm:$0xf0]  ;;  %v1882_v27 = vld [vmem:[#allocation10 + $0x78] sm:$0xf0] }
 0x19b   :  { %v878_v31 = vpop.f32.mrf.mxu0  ;;  %v864_v1 = vadd.f32 %v863_v20, %v851_v41  ;;  %v2010_v20 = vld [vmem:[#allocation10 + $0x178] sm:$0xf0]  ;;  %v1981_v41 = vor.u32 %v2186_v37, %v1978_v38  ;;  %v1885_v37 = vor.u32 %v2162_v26, %v1882_v27  ;;  %v1848_v38 = vld [vmem:[#allocation10 + $0x18] sm:$0xf] }
 0x19c   :  { %v2013_v25 = vor.u32 %v2194_v22, %v2010_v20  ;;  %v1970_v31 = vld [vmem:[#allocation10 + $0x130] sm:$0xf0]  ;;  %v1917_v20 = vor.u32 %v2170_v4, %v1914_v8 }
 0x19d   :  { %v877_v24 = vadd.f32 %v2543_v57, %v864_v1  ;;  %1429 = vmatpush.bf16.msrb.mxu3 %v2009_v21  ;;  %v1973_v35 = vor.u32 %v2185_v28, %v1970_v31  ;;  %1404 = vmatpush.bf16.msrb.mxu1 %v1969_v30  ;;  %v1906_v1 = vld [vmem:[#allocation10 + $0xb0] sm:$0xf0]  ;;  %v1840_v31 = vld [vmem:[#allocation10 + $0x10] sm:$0xf] }
 0x19e   :  { %1442 = vmatpush.bf16.msra.mxu0 %v2013_v25  ;;  %v1909_v7 = vor.u32 %v2169_v0, %v1906_v1  ;;  %v2166_v25 = vld [vmem:[#allocation10 + $0x74] sm:$0xf0] }
 0x19f   :  { %1417 = vmatpush.bf16.msrb.mxu2 %v1973_v35  ;;  %v1842_v35 = vld [vmem:[#allocation10 + $0x30] sm:$0xf0] }
 0x1a0   :  { %v852_v55 = vpop.f32.mrf.mxu2 }
 0x1a1   :  { %v865_v2 = vpop.f32.mrf.mxu3  ;;  %1430 = vmatpush.bf16.msrb.mxu3 %v1977_v36  ;;  %v1904_v55 = vld [vmem:[#allocation10 + $0x90] sm:$0xf]  ;;  %1405 = vmatpush.bf16.msrb.mxu1 %v1937_v47 }
 0x1a2   :  { %v889_v5 = vpop.f32.mrf.mxu1  ;;  %1443 = vmatpush.bf16.msra.mxu0 %v1981_v41  ;;  %v1912_v2 = vld [vmem:[#allocation10 + $0x98] sm:$0xf]  ;;  %v1905_v6 = vor.u32 %v2173_v63, %v1904_v55 }
 0x1a3   :  { %v928_v9 = vpop.f32.mrf.mxu0  ;;  %v890_v29 = vadd.f32 %v889_v5, %v877_v24  ;;  %1418 = vmatpush.bf16.msrb.mxu2 %v1941_v51  ;;  %v1913_v12 = vor.u32 %v2174_v3, %v1912_v2  ;;  %v1880_v24 = vld [vmem:[#allocation10 + $0x58] sm:$0xf]  ;;  %v1011_v51 = vld [vmem:[%s2579_s11] sm:$0xff] }
 0x1a4   :  { %v1881_v32 = vor.u32 %v2166_v25, %v1880_v24  ;;  %v1013_v54 = vperm.slane %v1011_v51, 0  ;;  %v1014_v55 = vperm.slane %v1011_v51, 1  ;;  %v1015_v1 = vperm.slane %v1011_v51, 2 }
 0x1a5   :  { %1431 = vmatpush.bf16.msrb.mxu3 %v1945_v52  ;;  %1406 = vmatpush.bf16.msrb.mxu1 %v1905_v6  ;;  %v1020_v26 = vperm.slane %v1011_v51, 7 }
 0x1a6   :  { %1444 = vmatpush.bf16.msra.mxu0 %v1949_v62 }
 0x1a7   :  { %1419 = vmatpush.bf16.msrb.mxu2 %v1909_v7  ;;  %v1016_v7 = vperm.slane %v1011_v51, 3 }
 0x1a8   :  { %v902_v34 = vpop.f32.mrf.mxu2 }
 0x1a9   :  { %v903_v39 = vadd.f32 %v902_v34, %v890_v29  ;;  %v915_v57 = vpop.f32.mrf.mxu3  ;;  %v1873_v29 = vor.u32 %v2165_v13, %v1872_v10  ;;  %1432 = vmatpush.bf16.msrb.mxu3 %v1913_v12  ;;  %v2153_v34 = vld [vmem:[#allocation10 + $0x14] sm:$0xf] }
 0x1aa   :  { %v891_v42 = vpop.f32.mrf.mxu1  ;;  %1445 = vmatpush.bf16.msra.mxu0 %v1917_v20  ;;  %v1845_v43 = vor.u32 %v2153_v34, %v1842_v35 }
 0x1ab   :  { %v916_v46 = vadd.f32 %v915_v57, %v903_v39  ;;  %v930_v15 = vpop.f32.mrf.mxu0  ;;  %v2158_v39 = vld [vmem:[#allocation10 + $0x34] sm:$0xf0]  ;;  %v2154_v57 = vld [vmem:[#allocation10 + $0x1c] sm:$0xf]  ;;  %1407 = vmatpush.bf16.msrb.mxu1 %v1873_v29  ;;  %v1841_v42 = vor.u32 %v2157_v33, %v1840_v31  ;;  %v1019_v29 = vperm.slane %v1011_v51, 6 }
 0x1ac   :  { %v1849_v44 = vor.u32 %v2158_v39, %v1848_v38 }
 0x1ad   :  { %v929_v58 = vadd.f32 %v928_v9, %v916_v46  ;;  %v2161_v9 = vld [vmem:[#allocation10 + $0x54] sm:$0xf]  ;;  %1433 = vmatpush.bf16.msrb.mxu3 %v1881_v32 }
 0x1ae   :  { %v1877_v30 = vor.u32 %v2161_v9, %v1874_v14  ;;  %1446 = vmatpush.bf16.msra.mxu0 %v1885_v37 }
 0x1af   :  { %v936_v5 = vadd.f32 %v2231_v40, %v929_v58  ;;  %v1850_v40 = vld [vmem:[#allocation10 + $0x38] sm:$0xf0]  ;;  %1408 = vmatpush.bf16.msrb.mxu1 %v1841_v42  ;;  %v2396_v58 = vmov 0.0  }
 0x1b0   :  { %v904_v11 = vpop.f32.mrf.mxu2  ;;  %1420 = vmatpush.bf16.msrb.mxu2 %v1877_v30  ;;  %v1853_v46 = vor.u32 %v2154_v57, %v1850_v40  ;;  %1503 = vst.msk [vmem:[#allocation11] sm:$0x1] %vm1502_vm6, %v2396_v58 }
 0x1b1   :  { %v937_v21 = vmul.f32 %v936_v5, %v936_v5  ;;  %v917_v22 = vpop.f32.mrf.mxu3  ;;  %1434 = vmatpush.bf16.msrb.mxu3 %v1849_v44  ;;  %v1017_v11 = vperm.slane %v1011_v51, 4 }
 0x1b2   :  { %1447 = vmatpush.bf16.msra.mxu0 %v1853_v46 }
 0x1b3   :  { %v938_v28 = vmul.f32 %v937_v21, %v936_v5 }
 0x1b4   :  { %1421 = vmatpush.bf16.msrb.mxu2 %v1845_v43 }
 0x1b5   :  { %v939_v36 = vmul.f32 0.044715, %v938_v28  ;;  %v1018_v28 = vperm.slane %v1011_v51, 5 }
 0x1b7   :  { %v940_v41 = vadd.f32 %v939_v36, %v936_v5 }
 0x1b9   :  { %v941_v45 = vmul.f32 0.7978846, %v940_v41 }
 0x1bb   :  { %2232 = vtanh.f32 %v941_v45 }
 0x1c1   :  { %v2233_v15 = vpop.eup %2232 }
 0x1c2   :  { %v943_v47 = vadd.f32 1.0, %v2233_v15 }
 0x1c4   :  { %v944_v48 = vmul.f32 0.5, %v943_v47 }
 0x1c6   :  { %v945_v49 = vmul.f32 %v944_v48, %v936_v5  ;;  %v1454_v48 = vshrl.u32 %v133_v23, 7 }
 0x1c8   :  { %v946_v50 = vpack.c.bf16 %v945_v49, %v945_v49  ;;  %vm1458_vm7 = vcmp.lt.s32.totalorder %v1454_v48, 2 }
 0x1c9   :  { %v2078_v49 = vsel %vm1458_vm7, 1.0, %v2396_v58 }
 0x1ca   :  { %1357 = vmatmul.bf16.vlgmr.msra.gmra.mxu1 %v946_v50  ;;  %1370 = vmatmul.bf16.vlgmr.msra.gmra.mxu2 %v946_v50 }
 0x1cb   :  { %1383 = vmatmul.bf16.vlgmr.msra.gmra.mxu3 %v946_v50  ;;  %1396 = vmatmul.bf16.vlgmr.msrb.gmra.mxu0 %v946_v50 }
 0x1da   :  { %1409 = vmatmul.bf16.vlgmr.msrb.gmra.mxu1 %v946_v50  ;;  %1422 = vmatmul.bf16.vlgmr.msrb.gmra.mxu2 %v946_v50 }
 0x1db   :  { %1435 = vmatmul.bf16.vlgmr.msrb.gmra.mxu3 %v946_v50  ;;  %1448 = vmatmul.bf16.vlgmr.msra.gmra.mxu0 %v946_v50 }
 0x247   :  { %v1358_v52 = vpop.f32.mrf.mxu1 }
 0x248   :  { %v1397_v53 = vpop.f32.mrf.mxu0  ;;  %v1359_v63 = vadd.f32 %v1358_v52, %v1013_v54 }
 0x249   :  { %v1398_v9 = vadd.f32 %v1397_v53, %v1016_v7 }
 0x24a   :  { %v1461_v6 = vsub.f32 %v2517_v56, %v1359_v63  ;;  %v1504_v63 = vld [vmem:[#allocation11] sm:$0x1] }
 0x24c   :  { %v1469_v13 = vmul.f32 %v1461_v6, %v1461_v6 }
 0x24d   :  { %v1371_v62 = vpop.f32.mrf.mxu2 }
 0x24e   :  { %v1372_v0 = vadd.f32 %v1371_v62, %v1014_v55  ;;  %v1384_v2 = vpop.f32.mrf.mxu3 }
 0x24f   :  { %v1360_v3 = vpop.f32.mrf.mxu1  ;;  %v1385_v8 = vadd.f32 %v1384_v2, %v1015_v1 }
 0x250   :  { %v1462_v4 = vsub.f32 %v2519_v59, %v1372_v0  ;;  %v1399_v5 = vpop.f32.mrf.mxu0  ;;  %v1464_v59 = vsub.f32 %v2523_v61, %v1398_v9 }
 0x251   :  { %v1463_v14 = vsub.f32 %v2521_v60, %v1385_v8 }
 0x252   :  { %v1470_v10 = vmul.f32 %v1462_v4, %v1462_v4  ;;  %v1472_v32 = vmul.f32 %v1464_v59, %v1464_v59 }
 0x253   :  { %v1471_v27 = vmul.f32 %v1463_v14, %v1463_v14 }
 0x254   :  { %v1477_v20 = vadd.f32 %v1470_v10, %v1469_v13 }
 0x255   :  { %v1373_v12 = vpop.f32.mrf.mxu2 }
 0x256   :  { %v1386_v21 = vpop.f32.mrf.mxu3  ;;  %v1478_v30 = vadd.f32 %v1477_v20, %v1471_v27 }
 0x257   :  { %v1410_v22 = vpop.f32.mrf.mxu1 }
 0x258   :  { %v1411_v24 = vadd.f32 %v1410_v22, %v1017_v11  ;;  %v1449_v25 = vpop.f32.mrf.mxu0  ;;  %v1479_v38 = vadd.f32 %v1478_v30, %v1472_v32 }
 0x259   :  { %v1450_v34 = vadd.f32 %v1449_v25, %v1020_v26 }
 0x25a   :  { %v1465_v56 = vsub.f32 %v2531_v16, %v1411_v24 }
 0x25b   :  { %v1468_v16 = vsub.f32 %v2537_v19, %v1450_v34 }
 0x25c   :  { %v1473_v33 = vmul.f32 %v1465_v56, %v1465_v56 }
 0x25d   :  { %v1423_v31 = vpop.f32.mrf.mxu2  ;;  %v1476_v45 = vmul.f32 %v1468_v16, %v1468_v16 }
 0x25e   :  { %v1424_v35 = vadd.f32 %v1423_v31, %v1018_v28  ;;  %v1436_v60 = vpop.f32.mrf.mxu3  ;;  %v1480_v40 = vadd.f32 %v1479_v38, %v1473_v33 }
 0x25f   :  { %v1437_v36 = vadd.f32 %v1436_v60, %v1019_v29  ;;  %v1412_v37 = vpop.f32.mrf.mxu1 }
 0x260   :  { %v1466_v39 = vsub.f32 %v2533_v17, %v1424_v35  ;;  %v1451_v57 = vpop.f32.mrf.mxu0 }
 0x261   :  { %v1467_v61 = vsub.f32 %v2535_v18, %v1437_v36 }
 0x262   :  { %v1474_v41 = vmul.f32 %v1466_v39, %v1466_v39 }
 0x263   :  { %v1475_v43 = vmul.f32 %v1467_v61, %v1467_v61 }
 0x264   :  { %v1481_v42 = vadd.f32 %v1480_v40, %v1474_v41 }
 0x265   :  { %v1425_v44 = vpop.f32.mrf.mxu2 }
 0x266   :  { %v1438_v46 = vpop.f32.mrf.mxu3  ;;  %v1482_v15 = vadd.f32 %v1481_v42, %v1475_v43 }
 0x268   :  { %v1483_v47 = vadd.f32 %v1482_v15, %v1476_v45 }
 0x26a   :  { %1484 = vadd.xlane.f32.xlu0 %v1483_v47 }
 0x2dd   :  { %v1485_v17 = vpop.xlane.xlu0 %1484 }
 0x2de   :  { %v1486_v50 = vmul.f32 %v2078_v49, %v1485_v17 }
 0x2e0   :  { %v1488_v18 = vsel %vm1487_vm8, %v1486_v50, 0.0 }
 0x2e1   :  { %1489 = vadd.xlane.f32.xlu1 %v1488_v18 }
 0x354   :  { %v1490_v51 = vpop.xlane.xlu1 %1489 }
 0x355   :  { %v1491_v19 = vrot.slane %v1490_v51, 4 }
 0x357   :  { %v1492_v52 = vadd.f32 %v1491_v19, %v1490_v51 }
 0x359   :  { %v1493_v53 = vrot.slane %v1492_v52, 2 }
 0x35b   :  { %v1494_v54 = vadd.f32 %v1493_v53, %v1492_v52 }
 0x35d   :  { %v1495_v55 = vrot.slane %v1494_v54, 1 }
 0x35f   :  { %v1496_v62 = vadd.f32 %v1495_v55, %v1494_v54 }
 0x361   :  { %2215 = vpush %v1496_v62 }
 0x392   :  { %s2216_s11 = spop %2215 }
 0x393   :  { %v1505_v0 = vstv %s2216_s11 }
 0x394   :  { %v1506_v1 = vadd.f32 %v1505_v0, %v1504_v63 }
 0x396   :  { %1508 = vst.msk [vmem:[#allocation11] sm:$0x1] %vm1502_vm6, %v1506_v1 }
 0x39d   :  { %v1512_v23 = vld [vmem:[#allocation11] sm:$0x1] }
 0x39e   :  { %v1513_v58 = vmul.f32 0.00048828125, %v1512_v23 }
 0x3a0   :  { %1514 = vst.msk [vmem:[#allocation11] sm:$0x1] %vm1502_vm6, %v1513_v58 }
 0x3a1   :  { %1525 = dma.vmem_to_hbm [thread:$0]  %s1521_s17, 16, %s1523_s20, [#allocation4]  }
 0x3a2   :  { %2384 = dma.done.wait [#allocation4], 16  }
 0x3a3   :  { %2385 = vsyncadd [#allocation4], 4294967280 }
 0x3a4   :  { %1530 = vsyncpa [#allocation3], 1 }
 0x3a5   :  { %1531 = vsyncpa [#allocation6], 1 }
 0x3a6   :  { %1532 = vsyncpa [#allocation9], 1 }
 0x3a7   :  { %1533 = vsyncpa [#allocation4], 1 }

</bundles_post_ra>
